<compile_context>
chip_gen: v5e
topology: v5e:2x2
jax: 0.10.0
libtpu: 0.0.40
codegen_flags: <defaults>
</compile_context>

<pallas_src>
import functools

import jax
import jax.numpy as jnp
from jax import lax
from jax.experimental import pallas as pl
from jax.experimental.pallas import tpu as pltpu


def _supervised_kernel(xr_ref, mask_ref, wk_ref, bconv_ref, wcls_ref, bcls_ref,
                       out_ref, *, H, W, Wp, K):
    """One batch item: conv3x3(+bias, ReLU) -> masked global-avg-pool -> linear head.

    xr_ref   : (1, R, C)        bf16  flattened zero-padded NHWC image rows
    mask_ref : (H*Wp, 1)        f32   1.0 for valid spatial positions, 0.0 for pad cols
    wk_ref   : (K*K, C, F)      bf16  conv weight per (ky, kx) tap
    bconv_ref: (1, F)           f32
    wcls_ref : (F, 128)         bf16  lane-padded classifier weight
    bcls_ref : (1, 128)         f32   lane-padded classifier bias
    out_ref  : (1, 1, 128)      f32   lane-padded logits for this batch item
    """
    F = wk_ref.shape[-1]
    L = H * Wp                                   # conv rows (incl. 2 pad cols per image row)

    # Conv as K*K shifted matmuls, accumulated in f32 (no im2col tensor anywhere).
    acc = jnp.zeros((L, F), jnp.float32)
    for idx in range(K * K):
        dy, dx = divmod(idx, K)
        win = xr_ref[0, pl.ds(dy * Wp + dx, L), :]            # (L, C) bf16
        acc = acc + jnp.dot(win, wk_ref[idx],
                            preferred_element_type=jnp.float32)

    # Per-position bias + ReLU (must happen before pooling), then mask out pad columns.
    conv = jnp.maximum(acc + bconv_ref[...], 0.0) * mask_ref[...]

    # Global average pool over the H*W valid positions.
    feats = jnp.sum(conv, axis=0, keepdims=True) * (1.0 / (H * W))   # (1, F) f32

    # Classifier head, computed once per batch item on the pooled features.
    logits = jnp.dot(feats.astype(wcls_ref.dtype), wcls_ref[...],
                     preferred_element_type=jnp.float32) + bcls_ref[...]
    out_ref[0] = logits


@jax.jit
def supervised_model_forward(x, w_conv, b_conv, w_cls, b_cls):
    B, C, H, W = x.shape
    F, _, K, _ = w_conv.shape
    NC = w_cls.shape[0]
    NC_PAD = 128                                  # lane-dense logits buffer
    Hp, Wp = H + 2, W + 2                         # zero-padded spatial extents (pad=1)

    # Activations: NCHW -> NHWC, zero-pad spatial, flatten (Hp, Wp) into rows, bf16.
    xr = jnp.pad(jnp.transpose(x, (0, 2, 3, 1)),
                 ((0, 0), (1, 1), (1, 1), (0, 0)))
    xr = xr.reshape(B, Hp * Wp, C)
    # Extra zero rows so every shifted slice [dy*Wp+dx : dy*Wp+dx + H*Wp) stays in bounds.
    R = ((Hp * Wp + 2 * Wp + 2 + 7) // 8) * 8
    xr = jnp.pad(xr, ((0, 0), (0, R - Hp * Wp), (0, 0))).astype(jnp.bfloat16)

    # Conv weight (F, C, K, K) -> (K*K, C, F), bf16.
    wk = jnp.transpose(w_conv, (2, 3, 1, 0)).reshape(K * K, C, F).astype(jnp.bfloat16)
    bconv2d = b_conv.reshape(1, F).astype(jnp.float32)

    # Classifier, lane-padded to 128 columns (sliced back after the call).
    wcls_p = jnp.zeros((F, NC_PAD), jnp.bfloat16).at[:, :NC].set(
        w_cls.T.astype(jnp.bfloat16))
    bcls_p = jnp.zeros((1, NC_PAD), jnp.float32).at[:, :NC].set(
        b_cls.astype(jnp.float32))

    # Valid-position mask over the H*Wp conv rows (kills the 2 pad columns per row).
    mask = ((jnp.arange(H * Wp) % Wp) < W).astype(jnp.float32).reshape(H * Wp, 1)

    kernel = functools.partial(_supervised_kernel, H=H, W=W, Wp=Wp, K=K)

    out = pl.pallas_call(
        kernel,
        out_shape=jax.ShapeDtypeStruct((B, 1, NC_PAD), jnp.float32),
        grid=(B,),
        in_specs=[
            pl.BlockSpec((1, R, C), lambda b: (b, 0, 0)),        # per-batch image slab
            pl.BlockSpec((H * Wp, 1), lambda b: (0, 0)),         # pooling mask
            pl.BlockSpec((K * K, C, F), lambda b: (0, 0, 0)),    # conv weights
            pl.BlockSpec((1, F), lambda b: (0, 0)),              # conv bias
            pl.BlockSpec((F, NC_PAD), lambda b: (0, 0)),         # classifier weight
            pl.BlockSpec((1, NC_PAD), lambda b: (0, 0)),         # classifier bias
        ],
        out_specs=pl.BlockSpec((1, 1, NC_PAD), lambda b: (b, 0, 0)),
        compiler_params=pltpu.CompilerParams(
            dimension_semantics=("parallel",),
            vmem_limit_bytes=32 * 1024 * 1024),
    )(xr, mask, wk, bconv2d, wcls_p, bcls_p)

    return out[:, 0, :NC]


def reference_forward(x, w_conv, b_conv, w_cls, b_cls):
    """Pure-JAX f32 reference matching the PyTorch module semantics."""
    conv = lax.conv_general_dilated(
        x, w_conv, window_strides=(1, 1), padding="SAME",
        dimension_numbers=("NCHW", "OIHW", "NCHW"))
    conv = conv + b_conv[None, :, None, None]
    conv = jnp.maximum(conv, 0.0)
    feats = jnp.mean(conv, axis=(2, 3))            # AdaptiveAvgPool2d(1) + squeeze
    return feats @ w_cls.T + b_cls[None, :]


if __name__ == "__main__":
    # Small shapes consistent with the module's forward.
    B, C, H, W = 2, 4, 16, 16
    feature_dim, num_classes, K = 32, 8, 3

    key = jax.random.PRNGKey(0)
    k_x, k_wc, k_bc, k_wl, k_bl = jax.random.split(key, 5)

    x = jax.random.normal(k_x, (B, C, H, W), dtype=jnp.float32)
    # Deterministic synthetic parameters (encoder conv + classifier linear).
    w_conv = jax.random.normal(k_wc, (feature_dim, C, K, K), dtype=jnp.float32) * 0.1
    b_conv = jax.random.normal(k_bc, (feature_dim,), dtype=jnp.float32) * 0.1
    w_cls = jax.random.normal(k_wl, (num_classes, feature_dim), dtype=jnp.float32) * 0.1
    b_cls = jax.random.normal(k_bl, (num_classes,), dtype=jnp.float32) * 0.1

    logits = supervised_model_forward(x, w_conv, b_conv, w_cls, b_cls)
    logits = jax.block_until_ready(logits)

    ref = reference_forward(x, w_conv, b_conv, w_cls, b_cls)
    assert logits.shape == (B, num_classes)
    # bf16 activations/weights (f32 accumulation) vs f32 reference -> loosened tolerance.
    assert jnp.allclose(logits, ref, atol=3e-2, rtol=3e-2), "mismatch vs JAX reference"

    print("KERNEL_OK")
</pallas_src>

<mosaic_0001>
module attributes {stable_mosaic.version = 11 : i64} {
  func.func @_supervised_kernel(%arg0: i32, %arg1: memref<1x368x4xbf16, #tpu.memory_space<vmem>>, %arg2: memref<288x1xf32, #tpu.memory_space<vmem>>, %arg3: memref<9x4x32xbf16, #tpu.memory_space<vmem>>, %arg4: memref<1x32xf32, #tpu.memory_space<vmem>>, %arg5: memref<32x128xbf16, #tpu.memory_space<vmem>>, %arg6: memref<1x128xf32, #tpu.memory_space<vmem>>, %arg7: memref<1x1x128xf32, #tpu.memory_space<vmem>>) attributes {dimension_semantics = [#tpu.dimension_semantics<parallel>], iteration_bounds = array<i64: 2>, scalar_prefetch = 0 : i64, scratch_operands = 0 : i64, tpu.core_type = #tpu.core_type<tc>, window_params = [{transform_indices = @transform_0, window_bounds = array<i64: 1, 368, 4>}, {pipeline_mode = #tpu.pipeline_mode<synchronous>, transform_indices = @transform_1, window_bounds = array<i64: 288, 1>}, {pipeline_mode = #tpu.pipeline_mode<synchronous>, transform_indices = @transform_2, window_bounds = array<i64: 9, 4, 32>}, {pipeline_mode = #tpu.pipeline_mode<synchronous>, transform_indices = @transform_3, window_bounds = array<i64: 1, 32>}, {pipeline_mode = #tpu.pipeline_mode<synchronous>, transform_indices = @transform_4, window_bounds = array<i64: 32, 128>}, {pipeline_mode = #tpu.pipeline_mode<synchronous>, transform_indices = @transform_5, window_bounds = array<i64: 1, 128>}, {transform_indices = @transform_6, window_bounds = array<i64: 1, 1, 128>}]} {
    %cst = arith.constant 0.000000e+00 : f32
    %0 = vector.broadcast %cst : f32 to vector<288x32xf32>
    %c0 = arith.constant 0 : index
    %c0_0 = arith.constant 0 : index
    %c0_1 = arith.constant 0 : index
    %1 = vector.load %arg1[%c0, %c0_0, %c0_1] : memref<1x368x4xbf16, #tpu.memory_space<vmem>>, vector<1x288x4xbf16>
    %2 = vector.shape_cast %1 : vector<1x288x4xbf16> to vector<288x4xbf16>
    %c0_2 = arith.constant 0 : index
    %c0_3 = arith.constant 0 : index
    %c0_4 = arith.constant 0 : index
    %3 = vector.load %arg3[%c0_2, %c0_3, %c0_4] : memref<9x4x32xbf16, #tpu.memory_space<vmem>>, vector<1x4x32xbf16>
    %4 = vector.shape_cast %3 : vector<1x4x32xbf16> to vector<4x32xbf16>
    %cst_5 = arith.constant dense<0.000000e+00> : vector<288x32xf32>
    %5 = tpu.matmul %2, %4, %cst_5 {dimension_numbers = #tpu.dot_dimension_numbers<[1], [0], [0], [1], [0, 0, 1, 1], [], []>} : vector<288x4xbf16>, vector<4x32xbf16>, vector<288x32xf32> -> vector<288x32xf32>
    %6 = arith.addf %0, %5 : vector<288x32xf32>
    %c0_6 = arith.constant 0 : index
    %c1 = arith.constant 1 : index
    %c0_7 = arith.constant 0 : index
    %7 = vector.load %arg1[%c0_6, %c1, %c0_7] : memref<1x368x4xbf16, #tpu.memory_space<vmem>>, vector<1x288x4xbf16>
    %8 = vector.shape_cast %7 : vector<1x288x4xbf16> to vector<288x4xbf16>
    %c1_8 = arith.constant 1 : index
    %c0_9 = arith.constant 0 : index
    %c0_10 = arith.constant 0 : index
    %9 = vector.load %arg3[%c1_8, %c0_9, %c0_10] : memref<9x4x32xbf16, #tpu.memory_space<vmem>>, vector<1x4x32xbf16>
    %10 = vector.shape_cast %9 : vector<1x4x32xbf16> to vector<4x32xbf16>
    %cst_11 = arith.constant dense<0.000000e+00> : vector<288x32xf32>
    %11 = tpu.matmul %8, %10, %cst_11 {dimension_numbers = #tpu.dot_dimension_numbers<[1], [0], [0], [1], [0, 0, 1, 1], [], []>} : vector<288x4xbf16>, vector<4x32xbf16>, vector<288x32xf32> -> vector<288x32xf32>
    %12 = arith.addf %6, %11 : vector<288x32xf32>
    %c0_12 = arith.constant 0 : index
    %c2 = arith.constant 2 : index
    %c0_13 = arith.constant 0 : index
    %13 = vector.load %arg1[%c0_12, %c2, %c0_13] : memref<1x368x4xbf16, #tpu.memory_space<vmem>>, vector<1x288x4xbf16>
    %14 = vector.shape_cast %13 : vector<1x288x4xbf16> to vector<288x4xbf16>
    %c2_14 = arith.constant 2 : index
    %c0_15 = arith.constant 0 : index
    %c0_16 = arith.constant 0 : index
    %15 = vector.load %arg3[%c2_14, %c0_15, %c0_16] : memref<9x4x32xbf16, #tpu.memory_space<vmem>>, vector<1x4x32xbf16>
    %16 = vector.shape_cast %15 : vector<1x4x32xbf16> to vector<4x32xbf16>
    %cst_17 = arith.constant dense<0.000000e+00> : vector<288x32xf32>
    %17 = tpu.matmul %14, %16, %cst_17 {dimension_numbers = #tpu.dot_dimension_numbers<[1], [0], [0], [1], [0, 0, 1, 1], [], []>} : vector<288x4xbf16>, vector<4x32xbf16>, vector<288x32xf32> -> vector<288x32xf32>
    %18 = arith.addf %12, %17 : vector<288x32xf32>
    %c0_18 = arith.constant 0 : index
    %c18 = arith.constant 18 : index
    %c0_19 = arith.constant 0 : index
    %19 = vector.load %arg1[%c0_18, %c18, %c0_19] : memref<1x368x4xbf16, #tpu.memory_space<vmem>>, vector<1x288x4xbf16>
    %20 = vector.shape_cast %19 : vector<1x288x4xbf16> to vector<288x4xbf16>
    %c3 = arith.constant 3 : index
    %c0_20 = arith.constant 0 : index
    %c0_21 = arith.constant 0 : index
    %21 = vector.load %arg3[%c3, %c0_20, %c0_21] : memref<9x4x32xbf16, #tpu.memory_space<vmem>>, vector<1x4x32xbf16>
    %22 = vector.shape_cast %21 : vector<1x4x32xbf16> to vector<4x32xbf16>
    %cst_22 = arith.constant dense<0.000000e+00> : vector<288x32xf32>
    %23 = tpu.matmul %20, %22, %cst_22 {dimension_numbers = #tpu.dot_dimension_numbers<[1], [0], [0], [1], [0, 0, 1, 1], [], []>} : vector<288x4xbf16>, vector<4x32xbf16>, vector<288x32xf32> -> vector<288x32xf32>
    %24 = arith.addf %18, %23 : vector<288x32xf32>
    %c0_23 = arith.constant 0 : index
    %c19 = arith.constant 19 : index
    %c0_24 = arith.constant 0 : index
    %25 = vector.load %arg1[%c0_23, %c19, %c0_24] : memref<1x368x4xbf16, #tpu.memory_space<vmem>>, vector<1x288x4xbf16>
    %26 = vector.shape_cast %25 : vector<1x288x4xbf16> to vector<288x4xbf16>
    %c4 = arith.constant 4 : index
    %c0_25 = arith.constant 0 : index
    %c0_26 = arith.constant 0 : index
    %27 = vector.load %arg3[%c4, %c0_25, %c0_26] : memref<9x4x32xbf16, #tpu.memory_space<vmem>>, vector<1x4x32xbf16>
    %28 = vector.shape_cast %27 : vector<1x4x32xbf16> to vector<4x32xbf16>
    %cst_27 = arith.constant dense<0.000000e+00> : vector<288x32xf32>
    %29 = tpu.matmul %26, %28, %cst_27 {dimension_numbers = #tpu.dot_dimension_numbers<[1], [0], [0], [1], [0, 0, 1, 1], [], []>} : vector<288x4xbf16>, vector<4x32xbf16>, vector<288x32xf32> -> vector<288x32xf32>
    %30 = arith.addf %24, %29 : vector<288x32xf32>
    %c0_28 = arith.constant 0 : index
    %c20 = arith.constant 20 : index
    %c0_29 = arith.constant 0 : index
    %31 = vector.load %arg1[%c0_28, %c20, %c0_29] : memref<1x368x4xbf16, #tpu.memory_space<vmem>>, vector<1x288x4xbf16>
    %32 = vector.shape_cast %31 : vector<1x288x4xbf16> to vector<288x4xbf16>
    %c5 = arith.constant 5 : index
    %c0_30 = arith.constant 0 : index
    %c0_31 = arith.constant 0 : index
    %33 = vector.load %arg3[%c5, %c0_30, %c0_31] : memref<9x4x32xbf16, #tpu.memory_space<vmem>>, vector<1x4x32xbf16>
    %34 = vector.shape_cast %33 : vector<1x4x32xbf16> to vector<4x32xbf16>
    %cst_32 = arith.constant dense<0.000000e+00> : vector<288x32xf32>
    %35 = tpu.matmul %32, %34, %cst_32 {dimension_numbers = #tpu.dot_dimension_numbers<[1], [0], [0], [1], [0, 0, 1, 1], [], []>} : vector<288x4xbf16>, vector<4x32xbf16>, vector<288x32xf32> -> vector<288x32xf32>
    %36 = arith.addf %30, %35 : vector<288x32xf32>
    %c0_33 = arith.constant 0 : index
    %c36 = arith.constant 36 : index
    %c0_34 = arith.constant 0 : index
    %37 = vector.load %arg1[%c0_33, %c36, %c0_34] : memref<1x368x4xbf16, #tpu.memory_space<vmem>>, vector<1x288x4xbf16>
    %38 = vector.shape_cast %37 : vector<1x288x4xbf16> to vector<288x4xbf16>
    %c6 = arith.constant 6 : index
    %c0_35 = arith.constant 0 : index
    %c0_36 = arith.constant 0 : index
    %39 = vector.load %arg3[%c6, %c0_35, %c0_36] : memref<9x4x32xbf16, #tpu.memory_space<vmem>>, vector<1x4x32xbf16>
    %40 = vector.shape_cast %39 : vector<1x4x32xbf16> to vector<4x32xbf16>
    %cst_37 = arith.constant dense<0.000000e+00> : vector<288x32xf32>
    %41 = tpu.matmul %38, %40, %cst_37 {dimension_numbers = #tpu.dot_dimension_numbers<[1], [0], [0], [1], [0, 0, 1, 1], [], []>} : vector<288x4xbf16>, vector<4x32xbf16>, vector<288x32xf32> -> vector<288x32xf32>
    %42 = arith.addf %36, %41 : vector<288x32xf32>
    %c0_38 = arith.constant 0 : index
    %c37 = arith.constant 37 : index
    %c0_39 = arith.constant 0 : index
    %43 = vector.load %arg1[%c0_38, %c37, %c0_39] : memref<1x368x4xbf16, #tpu.memory_space<vmem>>, vector<1x288x4xbf16>
    %44 = vector.shape_cast %43 : vector<1x288x4xbf16> to vector<288x4xbf16>
    %c7 = arith.constant 7 : index
    %c0_40 = arith.constant 0 : index
    %c0_41 = arith.constant 0 : index
    %45 = vector.load %arg3[%c7, %c0_40, %c0_41] : memref<9x4x32xbf16, #tpu.memory_space<vmem>>, vector<1x4x32xbf16>
    %46 = vector.shape_cast %45 : vector<1x4x32xbf16> to vector<4x32xbf16>
    %cst_42 = arith.constant dense<0.000000e+00> : vector<288x32xf32>
    %47 = tpu.matmul %44, %46, %cst_42 {dimension_numbers = #tpu.dot_dimension_numbers<[1], [0], [0], [1], [0, 0, 1, 1], [], []>} : vector<288x4xbf16>, vector<4x32xbf16>, vector<288x32xf32> -> vector<288x32xf32>
    %48 = arith.addf %42, %47 : vector<288x32xf32>
    %c0_43 = arith.constant 0 : index
    %c38 = arith.constant 38 : index
    %c0_44 = arith.constant 0 : index
    %49 = vector.load %arg1[%c0_43, %c38, %c0_44] : memref<1x368x4xbf16, #tpu.memory_space<vmem>>, vector<1x288x4xbf16>
    %50 = vector.shape_cast %49 : vector<1x288x4xbf16> to vector<288x4xbf16>
    %c8 = arith.constant 8 : index
    %c0_45 = arith.constant 0 : index
    %c0_46 = arith.constant 0 : index
    %51 = vector.load %arg3[%c8, %c0_45, %c0_46] : memref<9x4x32xbf16, #tpu.memory_space<vmem>>, vector<1x4x32xbf16>
    %52 = vector.shape_cast %51 : vector<1x4x32xbf16> to vector<4x32xbf16>
    %cst_47 = arith.constant dense<0.000000e+00> : vector<288x32xf32>
    %53 = tpu.matmul %50, %52, %cst_47 {dimension_numbers = #tpu.dot_dimension_numbers<[1], [0], [0], [1], [0, 0, 1, 1], [], []>} : vector<288x4xbf16>, vector<4x32xbf16>, vector<288x32xf32> -> vector<288x32xf32>
    %54 = arith.addf %48, %53 : vector<288x32xf32>
    %c0_48 = arith.constant 0 : index
    %c0_49 = arith.constant 0 : index
    %55 = vector.load %arg4[%c0_48, %c0_49] : memref<1x32xf32, #tpu.memory_space<vmem>>, vector<1x32xf32>
    %56 = vector.broadcast %55 : vector<1x32xf32> to vector<288x32xf32>
    %57 = arith.addf %54, %56 : vector<288x32xf32>
    %cst_50 = arith.constant 0.000000e+00 : f32
    %58 = vector.broadcast %cst_50 : f32 to vector<288x32xf32>
    %59 = arith.maximumf %57, %58 : vector<288x32xf32>
    %c0_51 = arith.constant 0 : index
    %c0_52 = arith.constant 0 : index
    %60 = vector.load %arg2[%c0_51, %c0_52] : memref<288x1xf32, #tpu.memory_space<vmem>>, vector<288x1xf32>
    %61 = vector.broadcast %60 : vector<288x1xf32> to vector<288x32xf32>
    %62 = arith.mulf %59, %61 : vector<288x32xf32>
    %cst_53 = arith.constant dense<0.000000e+00> : vector<32xf32>
    %63 = vector.multi_reduction <add>, %62, %cst_53 [0] : vector<288x32xf32> to vector<32xf32>
    %64 = vector.shape_cast %63 : vector<32xf32> to vector<1x32xf32>
    %cst_54 = arith.constant 3.906250e-03 : f32
    %65 = vector.broadcast %cst_54 : f32 to vector<1x32xf32>
    %66 = arith.mulf %64, %65 : vector<1x32xf32>
    %67 = arith.truncf %66 : vector<1x32xf32> to vector<1x32xbf16>
    %c0_55 = arith.constant 0 : index
    %c0_56 = arith.constant 0 : index
    %68 = vector.load %arg5[%c0_55, %c0_56] : memref<32x128xbf16, #tpu.memory_space<vmem>>, vector<32x128xbf16>
    %cst_57 = arith.constant dense<0.000000e+00> : vector<1x128xf32>
    %69 = tpu.matmul %67, %68, %cst_57 {dimension_numbers = #tpu.dot_dimension_numbers<[1], [0], [0], [1], [0, 0, 1, 1], [], []>} : vector<1x32xbf16>, vector<32x128xbf16>, vector<1x128xf32> -> vector<1x128xf32>
    %c0_58 = arith.constant 0 : index
    %c0_59 = arith.constant 0 : index
    %70 = vector.load %arg6[%c0_58, %c0_59] : memref<1x128xf32, #tpu.memory_space<vmem>>, vector<1x128xf32>
    %71 = arith.addf %69, %70 : vector<1x128xf32>
    %c0_60 = arith.constant 0 : index
    %c0_61 = arith.constant 0 : index
    %c0_62 = arith.constant 0 : index
    %72 = vector.load %arg7[%c0_60, %c0_61, %c0_62] : memref<1x1x128xf32, #tpu.memory_space<vmem>>, vector<1x1x128xf32>
    %73 = vector.shape_cast %72 : vector<1x1x128xf32> to vector<1x128xf32>
    %74 = vector.shape_cast %71 : vector<1x128xf32> to vector<1x1x128xf32>
    tpu.vector_store %arg7[%c0_60, %c0_61, %c0_62], %74 {strides = array<i32>} : memref<1x1x128xf32, #tpu.memory_space<vmem>>, vector<1x1x128xf32>,
    return
  }
  func.func @transform_0(%arg0: i32) -> (i32, i32, i32) {
    %c0_i32 = arith.constant 0 : i32
    %c0_i32_0 = arith.constant 0 : i32
    %c0_i32_1 = arith.constant 0 : i32
    return %arg0, %c0_i32, %c0_i32_0 : i32, i32, i32
  }
  func.func @transform_1(%arg0: i32) -> (i32, i32) {
    %c0_i32 = arith.constant 0 : i32
    %c0_i32_0 = arith.constant 0 : i32
    %c0_i32_1 = arith.constant 0 : i32
    return %c0_i32, %c0_i32_0 : i32, i32
  }
  func.func @transform_2(%arg0: i32) -> (i32, i32, i32) {
    %c0_i32 = arith.constant 0 : i32
    %c0_i32_0 = arith.constant 0 : i32
    %c0_i32_1 = arith.constant 0 : i32
    %c0_i32_2 = arith.constant 0 : i32
    return %c0_i32, %c0_i32_0, %c0_i32_1 : i32, i32, i32
  }
  func.func @transform_3(%arg0: i32) -> (i32, i32) {
    %c0_i32 = arith.constant 0 : i32
    %c0_i32_0 = arith.constant 0 : i32
    %c0_i32_1 = arith.constant 0 : i32
    return %c0_i32, %c0_i32_0 : i32, i32
  }
  func.func @transform_4(%arg0: i32) -> (i32, i32) {
    %c0_i32 = arith.constant 0 : i32
    %c0_i32_0 = arith.constant 0 : i32
    %c0_i32_1 = arith.constant 0 : i32
    return %c0_i32, %c0_i32_0 : i32, i32
  }
  func.func @transform_5(%arg0: i32) -> (i32, i32) {
    %c0_i32 = arith.constant 0 : i32
    %c0_i32_0 = arith.constant 0 : i32
    %c0_i32_1 = arith.constant 0 : i32
    return %c0_i32, %c0_i32_0 : i32, i32
  }
  func.func @transform_6(%arg0: i32) -> (i32, i32, i32) {
    %c0_i32 = arith.constant 0 : i32
    %c0_i32_0 = arith.constant 0 : i32
    %c0_i32_1 = arith.constant 0 : i32
    return %arg0, %c0_i32, %c0_i32_0 : i32, i32, i32
  }
}

</mosaic_0001>

<bundles_post_ra>
// kernel: supervised_model_forward.1
= control target key start
LH: loop header
LB: loop body
LE: loop exit
PB: predicated region body
PF: predicated region fallthrough
CT: control target
= control target key end

     0   :  { %11 = vsyncpa [#allocation3], 0  ;;  %s5573_s0 = inlined_call_operand.vmem [shape: bf16[2,368,4], index: 0, kind: input, shape index: {}]   ;;  %s5574_s1 = inlined_call_operand.vmem [shape: f32[288,1], index: 1, kind: input, shape index: {}]   ;;  %s5575_s2 = inlined_call_operand.vmem [shape: bf16[9,4,32], index: 2, kind: input, shape index: {}]   ;;  %s5576_s3 = inlined_call_operand.vmem [shape: f32[1,32], index: 3, kind: input, shape index: {}]   ;;  %s5577_s4 = inlined_call_operand.vmem [shape: bf16[32,128], index: 4, kind: input, shape index: {}]   ;;  %s5578_s5 = inlined_call_operand.vmem [shape: f32[1,128], index: 5, kind: input, shape index: {}]   ;;  %s5579_s6 = inlined_call_operand.hbm [shape: f32[2,1,128], index: 6, kind: output, shape index: {}]  }
   0x1   :  { %13 = vsyncpa [#allocation3 + $0x1], 0  ;;  %s4118_s21 = smov 0   ;;  %s4120_s22 = smov 0  }
   0x2   :  { %s4122_s23 = smov 0   ;;  %s4124_s24 = smov 0  }
   0x3 LB: > { %s4139_s25 = sadd.s32 4294967295, %s4080_s24   ;;  %s3506_s26 = sadd.s32 4294967294, %s4080_s24   ;;  %s4080_s24 = sphi %s4124_s24, %s5605_s24   ;;  %s4076_s23 = sphi %s4122_s23, %s5604_s23   ;;  %s4072_s22 = sphi %s4120_s22, %s5603_s22   ;;  %s4068_s21 = sphi %s4118_s21, %s5602_s21  }
   0x4   : > { %s4143_s27 = sadd.s32 1, %s4080_s24   ;;  %s157_s28 = sadd.s32 1, %s4076_s23 }
   0x5   : > { %s154_s29 = ssub.s32 %s4080_s24, %s4143_s27  ;;  %p167_p0 = scmp.ne.s32.totalorder %s4076_s23, %s4072_s22 }
   0x6   : > { %p155_p1 = scmp.eq.s32.totalorder %s154_s29, 0  ;;  %p168_p2 = scmp.eq.s32.totalorder %s4139_s25, 1 }
   0x7   : > { %p173_p3 = scmp.ne.s32.totalorder %s4072_s22, %s4068_s21  ;;  %p174_p4 = scmp.eq.s32.totalorder %s3506_s26, 1 }
   0x8   : > { %s4154_s30 = scalar_select %p155_p1, %s4076_s23, %s157_s28  }
   0x9   : > { %p4156_p5 = por %p168_p2, %p167_p0  ;;  %p4160_p6 = por %p174_p4, %p173_p3 }
   0xa   : > { %p3509_p7 = scmp.ge.s32.totalorder %s4080_s24, 1  ;;  %p215_p8 = scmp.lt.s32.totalorder %s4080_s24, 3 }
   0xc   : > { %p216_p9 = pnand %p3509_p7, %p215_p8 }
   0xe   : > { %219 = sbr.rel (%p216_p9) target bundleno = 980 (0x3d4), region = 44 }
  0x13   : > { %v3511_v0 = vld [vmem:[%s5575_s2 + $0x2] sm:$0x3]  ;;  %vm587_vm0 = vcmask 1041408   ;;  %p244_p10 = scmp.lt.s32.totalorder %s4139_s25, 1  ;;  %v3616_v2 = vld [vmem:[%s5575_s2 + $0x4] sm:$0x3] }
  0x14   : > { %v589_v1 = vsel %vm587_vm0, %v3511_v0, 0  ;;  %v3635_v3 = vld [vmem:[%s5575_s2 + $0x6] sm:$0x3]  ;;  %v927_v4 = vsel %vm587_vm0, %v3616_v2, 0  ;;  %v3722_v6 = vld [vmem:[%s5575_s2 + $0x8] sm:$0x3] }
  0x15   : > { %3956 = vmatpush.bf16.msra.mxu1 %v589_v1  ;;  %3957 = vmatpush.bf16.msra.mxu2 %v589_v1  ;;  %s245_s15 = scalar_select %p244_p10, %s4139_s25, 1  ;;  %v1288_v5 = vsel %vm587_vm0, %v3635_v3, 0  ;;  %v1657_v7 = vsel %vm587_vm0, %v3722_v6, 0  ;;  %vm383_vm1 = vsmask.f32 7424  ;;  %vm532_vm2 = vcmask 31744  }
  0x16   : > { %3958 = vmatpush.bf16.msra.mxu3 %v589_v1  ;;  %598 = vmatpush.bf16.msra.mxu0 %v589_v1  ;;  %v286_v52 = vld [vmem:[%s5575_s2] sm:$0x3]  ;;  %vm834_vm3 = vcmask 1046528   ;;  %vm1431_vm4 = vsmask.f32 6400  ;;  %vm1800_vm5 = vcmask 1045504  }
  0x17   : > { %s3959_s18 = smul.u32 184, %s245_s15  ;;  %v727_v57 = vsel %vm587_vm0, %v286_v52, 0  ;;  %vm2397_vm6 = vsmask.f32 5376  ;;  %vm2766_vm7 = vcmask 1044480   ;;  %vm3324_vm8 = vcmask 261120   ;;  %s3447_s15 = scalar_lea.hbm %s5579_s6, %s4139_s25 }
  0x18   : > { %s242_s12 = sand.u32 1, %s4072_s22   ;;  %s3451_s20 = sshll.u32 %s3447_s15, 4  ;;  %s3452_s20 = int_to_ptr.hbm [resolvable:$true] %s3451_s20 }
  0x19   : > { %936 = vmatpush.bf16.msrb.mxu2 %v927_v4  ;;  %s4187_s26 = scalar_lea.vmem %s5573_s0, %s3959_s18  ;;  %736 = vmatpush.bf16.msrb.mxu1 %v727_v57  ;;  %s243_s18 = scalar_lea.vmem [#allocation2], %s242_s12 }
  0x1a   : > { %1297 = vmatpush.bf16.msrb.mxu3 %v1288_v5  ;;  %1666 = vmatpush.bf16.msrb.mxu0 %v1657_v7  ;;  %v4190_v8 = vld [vmem:[%s4187_s26 + $0x28] sm:$0xff]  ;;  %v4193_v9 = vld [vmem:[%s4187_s26 + $0x30] sm:$0xff]  ;;  %v4196_v10 = vld [vmem:[%s4187_s26 + $0x40] sm:$0xff]  ;;  %s3449_s19 = sshll.u32 %s243_s18, 4  ;;  %s3439_s28 = scalar_lea.sflag [#allocation3], %s242_s12  ;;  %s3450_s19 = int_to_ptr.vmem [resolvable:$true] %s3449_s19 }
  0x1b   : > { %v4199_v11 = vld [vmem:[%s4187_s26 + $0x48] sm:$0xff]  ;;  %v4205_v13 = vld [vmem:[%s4187_s26 + $0x70] sm:$0xff]  ;;  %v424_v14 = vshll.u32 %v4190_v8, 16  ;;  %v428_v15 = vshrl.u32 %v4190_v8, 16  ;;  %v432_v16 = vshll.u32 %v4193_v9, 16  ;;  %v448_v17 = vshll.u32 %v4196_v10, 16 }
  0x1c   : > { %v4202_v12 = vld [vmem:[%s4187_s26 + $0x68] sm:$0xff]  ;;  %v4212_v18 = vld [vmem:[%s4187_s26] sm:$0xff]   ;;  %v452_v20 = vshrl.u32 %v4196_v10, 16  ;;  %v456_v21 = vshll.u32 %v4199_v11, 16  ;;  %v496_v27 = vshll.u32 %v4205_v13, 16  ;;  %v4241_v43 = vld [vmem:[%s4187_s26 + $0x38] sm:$0xff] }
  0x1d   : > { %v4215_v19 = vld [vmem:[%s4187_s26 + $0x8] sm:$0xff]  ;;  %v488_v22 = vshll.u32 %v4202_v12, 16  ;;  %v492_v23 = vshrl.u32 %v4202_v12, 16  ;;  %v4221_v24 = vrot.slane %v424_v14, 1  ;;  %v434_v25 = vrot.slane %v432_v16, 1  ;;  %v4244_v44 = vld [vmem:[%s4187_s26 + $0x50] sm:$0xff] }
  0x1e   : > { %v4223_v26 = vrot.slane %v448_v17, 1  ;;  %v458_v28 = vrot.slane %v456_v21, 1  ;;  %v385_v30 = vshrl.u32 %v4212_v18, 16  ;;  %v387_v31 = vshll.u32 %v4212_v18, 16  ;;  %v4248_v46 = vld [vmem:[%s4187_s26 + $0x78] sm:$0xff]  ;;  %v4252_v47 = vld [vmem:[%s4187_s26 + $0x10] sm:$0xff] }
  0x1f   : > { %v4226_v29 = vrot.slane %v488_v22, 1  ;;  %v430_v32 = vor.u32 %v428_v15, %v4221_v24  ;;  %v498_v34 = vrot.slane %v496_v27, 1  ;;  %v392_v35 = vshll.u32 %v4215_v19, 16  ;;  %v4267_v0 = vld [vmem:[%s4187_s26 + $0x60] sm:$0xff]  ;;  %v4278_v14 = vld [vmem:[%s4187_s26 + $0x58] sm:$0xff]  ;;  %v4313_v52 = vld [vmem:[%s4187_s26 + $0x88] sm:$0xff] }
  0x20   : > { %v454_v33 = vor.u32 %v452_v20, %v4223_v26  ;;  %v389_v37 = vrot.slane %v387_v31, 1  ;;  %v436_v48 = vshrl.u32 %v4193_v9, 16  ;;  %v440_v49 = vshll.u32 %v4241_v43, 16  ;;  %v4281_v15 = vld [vmem:[%s4187_s26 + $0x80] sm:$0xff]  ;;  %v4286_v20 = vld [vmem:[%s4187_s26 + $0x18] sm:$0xff]  ;;  %s4032_s29 = sshra.s32 %s3452_s20, 4  ;;  %s4033_s29 = int_to_ptr.hbm [resolvable:$true] %s4032_s29 }
  0x21   : > { %v494_v36 = vor.u32 %v492_v23, %v4226_v29  ;;  %v435_v38 = vsel %vm383_vm1, %v430_v32, %v434_v25  ;;  %v394_v40 = vrot.slane %v392_v35, 1  ;;  %v460_v50 = vshrl.u32 %v4199_v11, 16  ;;  %s4038_s10 = scalar_lea.hbm %s5579_s6, 2  ;;  %p4039_p0 = scmp.lt.s32.totalorder %s4033_s29, %s5579_s6 }
  0x22   : > { %v459_v39 = vsel %vm383_vm1, %v454_v33, %v458_v28  ;;  %3585 = vmatmul.msk.bf16.vlgmr.msra.gmra.mxu1 %vm532_vm2, %v435_v38  ;;  %v390_v42 = vor.u32 %v389_v37, %v385_v30  ;;  %v464_v51 = vshll.u32 %v4244_v44, 16  ;;  %v500_v53 = vshrl.u32 %v4205_v13, 16  ;;  %v4294_v30 = vld [vmem:[%s4187_s26 + $0x20] sm:$0xff] }
  0x23   : > { %3588 = vmatmul.msk.bf16.vlgmr.msra.gmra.mxu2 %vm532_vm2, %v459_v39  ;;  %v499_v41 = vsel %vm383_vm1, %v494_v36, %v498_v34  ;;  %v504_v54 = vshll.u32 %v4248_v46, 16  ;;  %v396_v55 = vshrl.u32 %v4215_v19, 16  ;;  %v400_v56 = vshll.u32 %v4252_v47, 16 }
  0x24   : > { %3593 = vmatmul.msk.bf16.vlgmr.msra.gmra.mxu3 %vm532_vm2, %v499_v41  ;;  %v395_v45 = vsel %vm383_vm1, %v390_v42, %v394_v40  ;;  %v438_v58 = vor.u32 %v436_v48, %v434_v25  ;;  %v442_v59 = vrot.slane %v440_v49, 1  ;;  %v462_v60 = vor.u32 %v460_v50, %v458_v28 }
  0x25   : > { %3580 = vmatmul.msk.bf16.vlgmr.msra.gmra.mxu0 %vm532_vm2, %v395_v45  ;;  %v466_v61 = vrot.slane %v464_v51, 1  ;;  %v502_v62 = vor.u32 %v500_v53, %v498_v34  ;;  %v506_v63 = vrot.slane %v504_v54, 1  ;;  %v398_v1 = vor.u32 %v396_v55, %v394_v40 }
  0x26   : > { %v402_v2 = vrot.slane %v400_v56, 1  ;;  %v443_v3 = vsel %vm383_vm1, %v438_v58, %v442_v59  ;;  %v480_v6 = vshll.u32 %v4267_v0, 16  ;;  %v484_v17 = vshrl.u32 %v4267_v0, 16 }
  0x27   : > { %v467_v4 = vsel %vm383_vm1, %v462_v60, %v466_v61  ;;  %v507_v5 = vsel %vm383_vm1, %v502_v62, %v506_v63  ;;  %v444_v21 = vshrl.u32 %v4241_v43, 16  ;;  %v468_v22 = vshrl.u32 %v4244_v44, 16  ;;  %v287_v60 = vld [vmem:[%s4187_s26 + $0x90] sm:$0x1] }
  0x28   : > { %v403_v7 = vsel %vm383_vm1, %v398_v1, %v402_v2  ;;  %v482_v16 = vrot.slane %v480_v6, 1  ;;  %v472_v23 = vshll.u32 %v4278_v14, 16  ;;  %v508_v27 = vshrl.u32 %v4248_v46, 16  ;;  %v3866_v6 = vld [vmem:[%s5575_s2 + $0x10] sm:$0x3] }
  0x29   : > { %v512_v28 = vshll.u32 %v4281_v15, 16  ;;  %v404_v32 = vshrl.u32 %v4252_v47, 16  ;;  %v408_v33 = vshll.u32 %v4286_v20, 16  ;;  %v446_v34 = vor.u32 %v444_v21, %v442_v59 }
  0x2a   : > { %v486_v25 = vor.u32 %v484_v17, %v482_v16  ;;  %v470_v35 = vor.u32 %v468_v22, %v466_v61  ;;  %v474_v36 = vrot.slane %v472_v23, 1  ;;  %v510_v37 = vor.u32 %v508_v27, %v506_v63  ;;  %v1064_v23 = vld [vmem:[%s4187_s26 + $0x8] sm:$0xe] }
  0x2b   : > { %v514_v38 = vrot.slane %v512_v28, 1  ;;  %v416_v39 = vshll.u32 %v4294_v30, 16  ;;  %v406_v40 = vor.u32 %v404_v32, %v402_v2  ;;  %v410_v41 = vrot.slane %v408_v33, 1  ;;  %v3760_v2 = vld [vmem:[%s5575_s2 + $0xc] sm:$0x3] }
  0x2c   : > { %v4298_v31 = vsel %vm383_vm1, %v486_v25, %v4226_v29  ;;  %v451_v42 = vsel %vm383_vm1, %v446_v34, %v4223_v26  ;;  %v475_v29 = vsel %vm383_vm1, %v470_v35, %v474_v36  ;;  %v420_v49 = vshrl.u32 %v4294_v30, 16  ;;  %v4353_v25 = vld [vmem:[%s4187_s26 + $0xc] sm:$0xf]  ;;  %v4362_v35 = vld [vmem:[%s4187_s26 + $0x10] sm:$0xff] }
  0x2d   : > { %v515_v45 = vsel %vm383_vm1, %v510_v37, %v514_v38  ;;  %v418_v48 = vrot.slane %v416_v39, 1  ;;  %v411_v50 = vsel %vm383_vm1, %v406_v40, %v410_v41  ;;  %v476_v53 = vshrl.u32 %v4278_v14, 16  ;;  %v3953_v37 = vld [vmem:[%s4187_s26] sm:$0xf0] }
  0x2e   : > { %v516_v54 = vshrl.u32 %v4281_v15, 16  ;;  %v520_v55 = vshll.u32 %v4313_v52, 16  ;;  %v412_v56 = vshrl.u32 %v4286_v20, 16  ;;  %v2859_v17 = vsel %vm587_vm0, %v3866_v6, 0 }
  0x2f   : > { %v422_v51 = vor.u32 %v420_v49, %v418_v48  ;;  %v478_v57 = vor.u32 %v476_v53, %v474_v36  ;;  %v524_v21 = vshrl.u32 %v4313_v52, 16  ;;  %2868 = vmatpush.bf16.msra.mxu0 %v2859_v17  ;;  %v1140_v32 = vunpack.c.l.b16 %v1064_v23 }
  0x30   : > { %v518_v58 = vor.u32 %v516_v54, %v514_v38  ;;  %v522_v59 = vrot.slane %v520_v55, 1  ;;  %v414_v61 = vor.u32 %v412_v56, %v410_v41  ;;  %v5580_v33 = vunpack.c.l.b16 %v4353_v25  ;;  %v3954_v38 = vld [vmem:[%s4187_s26] sm:$0xe] }
  0x31   : > { %v427_v26 = vsel %vm383_vm1, %v422_v51, %v4221_v24  ;;  %v483_v62 = vsel %vm383_vm1, %v478_v57, %v482_v16  ;;  %v363_v24 = vunpack.c.l.b16 %v287_v60  ;;  %v1441_v41 = vshrl.u32 %v4362_v35, 16 }
  0x32   : > { %3586 = vmatmul.msk.bf16.gmra.mxu1 %vm532_vm2, %v443_v3  ;;  %v523_v63 = vsel %vm383_vm1, %v518_v58, %v522_v59  ;;  %v419_v1 = vsel %vm383_vm1, %v414_v61, %v418_v48  ;;  %v526_v27 = vor.u32 %v524_v21, %v522_v59  ;;  %v1177_v36 = vpack.c.b16 %v5580_v33, %v1140_v32  ;;  %v4411_v32 = vld [vmem:[%s4187_s26 + $0x28] sm:$0xff] }
  0x33   : > { %3589 = vmatmul.msk.bf16.gmra.mxu2 %vm532_vm2, %v467_v4  ;;  %v4333_v3 = vpack.c.b16 %v363_v24, %v363_v24  ;;  %v2254_v4 = vsel %vm587_vm0, %v3760_v2, 0  ;;  %v1443_v48 = vrot.slane %v1441_v41, 1  ;;  %v836_v51 = vrot.slane %v4215_v19, 1 }
  0x34   : > { %3594 = vmatmul.msk.bf16.gmra.mxu3 %vm532_vm2, %v507_v5  ;;  %2263 = vmatpush.bf16.msra.mxu2 %v2254_v4  ;;  %v3741_v5 = vld [vmem:[%s5575_s2 + $0xa] sm:$0x3]  ;;  %v1433_v39 = vshrl.u32 %v1177_v36, 16  ;;  %v1436_v40 = vshll.u32 %v1177_v36, 16  ;;  %v1196_v53 = vrot.slane %v1177_v36, 1  ;;  %v1197_v54 = vrot.slane %v4362_v35, 1 }
  0x35   : > { %3581 = vmatmul.msk.bf16.gmra.mxu0 %vm532_vm2, %v403_v7  ;;  %v1893_v16 = vsel %vm587_vm0, %v3741_v5, 0  ;;  %v528_v22 = vshll.u32 %v4333_v3, 16  ;;  %v4396_v5 = vld [vmem:[%s4187_s26 + $0x20] sm:$0xff]  ;;  %v840_v17 = vrot.slane %v4286_v20, 1 }
  0x36   : > { %1902 = vmatpush.bf16.msra.mxu1 %v1893_v16  ;;  %v1198_v57 = vsel %vm834_vm3, %v1196_v53, %v1197_v54  ;;  %v1462_v6 = vshll.u32 %v4396_v5, 16  ;;  %v1201_v21 = vrot.slane %v4396_v5, 1 }
  0x37   : > { %v530_v28 = vrot.slane %v528_v22, 1 }
  0x38   : > { %v1464_v16 = vrot.slane %v1462_v6, 2 }
  0x39   : > { %v531_v34 = vsel %vm383_vm1, %v526_v27, %v530_v28 }
  0x42   : > { %3587 = vmatmul.msk.bf16.gmra.mxu1 %vm532_vm2, %v451_v42  ;;  %v3955_v42 = vor.u32 %v3954_v38, %v3953_v37  ;;  %v842_v38 = vrot.slane %v4294_v30, 1 }
  0x43   : > { %3590 = vmatmul.msk.bf16.gmra.mxu2 %vm532_vm2, %v475_v29  ;;  %v1435_v29 = vrot.slane %v1433_v39, 1  ;;  %v1203_v39 = vrot.slane %v4411_v32, 1 }
  0x44   : > { %3595 = vmatmul.msk.bf16.gmra.mxu3 %vm532_vm2, %v515_v45  ;;  %v1438_v45 = vrot.slane %v1436_v40, 2 }
  0x45   : > { %3582 = vmatmul.msk.bf16.gmra.mxu0 %vm532_vm2, %v411_v50  ;;  %v835_v50 = vrot.slane %v3955_v42, 1  ;;  %v1204_v42 = vsel %vm834_vm3, %v1201_v21, %v1203_v39 }
  0x47   : > { %v837_v56 = vsel %vm834_vm3, %v835_v50, %v836_v51 }
  0x52   : > { %3598 = vmatmul.msk.bf16.vlgmr.msrb.gmra.mxu1 %vm532_vm2, %v4212_v18  ;;  %v3847_v18 = vld [vmem:[%s5575_s2 + $0xe] sm:$0x3] }
  0x53   : > { %3591 = vmatmul.msk.bf16.gmra.mxu2 %vm532_vm2, %v483_v62  ;;  %v2623_v7 = vsel %vm587_vm0, %v3847_v18, 0 }
  0x54   : > { %3596 = vmatmul.msk.bf16.gmra.mxu3 %vm532_vm2, %v523_v63  ;;  %v838_v63 = vrot.slane %v4252_v47, 1 }
  0x55   : > { %3583 = vmatmul.msk.bf16.gmra.mxu0 %vm532_vm2, %v419_v1  ;;  %2632 = vmatpush.bf16.msra.mxu3 %v2623_v7 }
  0x56   : > { %v839_v2 = vsel %vm834_vm3, %v836_v51, %v838_v63  ;;  %v841_v23 = vsel %vm834_vm3, %v838_v63, %v840_v17 }
  0x62   : > { %3599 = vmatmul.msk.bf16.gmra.mxu1 %vm532_vm2, %v4215_v19  ;;  %v4381_v19 = vld [vmem:[%s4187_s26 + $0x18] sm:$0xff] }
  0x63   : > { %3592 = vmatmul.msk.bf16.gmra.mxu2 %vm532_vm2, %v4298_v31  ;;  %v1444_v31 = vshll.u32 %v4362_v35, 16  ;;  %v1450_v59 = vshrl.u32 %v4381_v19, 16  ;;  %v1453_v60 = vshll.u32 %v4381_v19, 16  ;;  %v1199_v24 = vrot.slane %v4381_v19, 1 }
  0x64   : > { %3597 = vmatmul.msk.bf16.gmra.mxu3 %vm532_vm2, %v531_v34  ;;  %v1471_v34 = vshll.u32 %v4411_v32, 16 }
  0x65   : > { %3584 = vmatmul.msk.bf16.gmra.mxu0 %vm532_vm2, %v427_v26  ;;  %v1446_v49 = vrot.slane %v1444_v31, 2  ;;  %v1439_v26 = vor.u32 %v1438_v45, %v1435_v29  ;;  %v1452_v61 = vrot.slane %v1450_v59, 1  ;;  %v1455_v62 = vrot.slane %v1453_v60, 2 }
  0x66   : > { %v1200_v4 = vsel %vm834_vm3, %v1197_v54, %v1199_v24  ;;  %v1202_v27 = vsel %vm834_vm3, %v1199_v24, %v1201_v21  ;;  %v1473_v37 = vrot.slane %v1471_v34, 2  ;;  %v843_v31 = vsel %vm834_vm3, %v840_v17, %v842_v38 }
  0x67   : > { %v1447_v55 = vor.u32 %v1446_v49, %v1443_v48  ;;  %v1456_v1 = vor.u32 %v1455_v62, %v1452_v61  ;;  %v3917_v48 = vld [vmem:[%s4187_s26 + $0x30] sm:$0xff]  ;;  %v846_v21 = vrot.slane %v4193_v9, 1 }
  0x68   : > { %v1477_v50 = vshrl.u32 %v3917_v48, 16  ;;  %v1480_v51 = vshll.u32 %v3917_v48, 16 }
  0x69   : > { %v1448_v58 = vsel %vm1431_vm4, %v1439_v26, %v1447_v55  ;;  %v1457_v18 = vsel %vm1431_vm4, %v1447_v55, %v1456_v1 }
  0x6a   : > { %v1479_v26 = vrot.slane %v1477_v50, 1  ;;  %v1482_v55 = vrot.slane %v1480_v51, 2 }
  0x6c   : > { %v1483_v60 = vor.u32 %v1482_v55, %v1479_v26  ;;  %v848_v26 = vrot.slane %v4241_v43, 1 }
  0x72   : > { %3600 = vmatmul.msk.bf16.gmra.mxu1 %vm532_vm2, %v4252_v47  ;;  %v1459_v47 = vshrl.u32 %v4396_v5, 16 }
  0x73   : > { %3617 = vmatmul.msk.bf16.vlgmr.msrb.gmra.mxu2 %vm532_vm2, %v837_v56  ;;  %v844_v56 = vrot.slane %v4190_v8, 1 }
  0x74   : > { %3704 = vmatmul.msk.bf16.vlgmr.msrb.gmra.mxu3 %vm532_vm2, %v1198_v57  ;;  %v1461_v7 = vrot.slane %v1459_v47, 1  ;;  %v1205_v57 = vrot.slane %v3917_v48, 1 }
  0x75   : > { %3723 = vmatmul.msk.bf16.vlgmr.msrb.gmra.mxu0 %vm532_vm2, %v1448_v58  ;;  %v845_v62 = vsel %vm834_vm3, %v842_v38, %v844_v56  ;;  %v847_v34 = vsel %vm834_vm3, %v844_v56, %v846_v21  ;;  %v3919_v38 = vld [vmem:[%s4187_s26 + $0x40] sm:$0xff] }
  0x76   : > { %v1465_v22 = vor.u32 %v1464_v16, %v1461_v7  ;;  %v1206_v63 = vsel %vm834_vm3, %v1203_v39, %v1205_v57  ;;  %v1209_v55 = vrot.slane %v3919_v38, 1 }
  0x78   : > { %v1466_v28 = vsel %vm1431_vm4, %v1456_v1, %v1465_v22  ;;  %v3918_v1 = vld [vmem:[%s4187_s26 + $0x38] sm:$0xff] }
  0x79   : > { %v1489_v47 = vshll.u32 %v3918_v1, 16 }
  0x7b   : > { %v1491_v17 = vrot.slane %v1489_v47, 2  ;;  %v3920_v47 = vld [vmem:[%s4187_s26 + $0x48] sm:$0xff] }
  0x82   : > { %3601 = vmatmul.msk.bf16.gmra.mxu1 %vm532_vm2, %v4286_v20  ;;  %v1468_v20 = vshrl.u32 %v4411_v32, 16 }
  0x83   : > { %3618 = vmatmul.msk.bf16.gmra.mxu2 %vm532_vm2, %v839_v2 }
  0x84   : > { %3705 = vmatmul.msk.bf16.gmra.mxu3 %vm532_vm2, %v1200_v4  ;;  %v1470_v36 = vrot.slane %v1468_v20, 1 }
  0x85   : > { %3724 = vmatmul.msk.bf16.gmra.mxu0 %vm532_vm2, %v1457_v18  ;;  %v1486_v18 = vshrl.u32 %v3918_v1, 16 }
  0x86   : > { %v1474_v40 = vor.u32 %v1473_v37, %v1470_v36 }
  0x87   : > { %v1488_v16 = vrot.slane %v1486_v18, 1 }
  0x88   : > { %v1475_v45 = vsel %vm1431_vm4, %v1465_v22, %v1474_v40  ;;  %v1207_v22 = vrot.slane %v3918_v1, 1 }
  0x8a   : > { %v1208_v36 = vsel %vm834_vm3, %v1205_v57, %v1207_v22  ;;  %v1210_v1 = vsel %vm834_vm3, %v1207_v22, %v1209_v55 }
  0x92   : > { %3602 = vmatmul.msk.bf16.gmra.mxu1 %vm532_vm2, %v4294_v30 }
  0x93   : > { %3619 = vmatmul.msk.bf16.gmra.mxu2 %vm532_vm2, %v841_v23 }
  0x94   : > { %3706 = vmatmul.msk.bf16.gmra.mxu3 %vm532_vm2, %v1202_v27 }
  0x95   : > { %3725 = vmatmul.msk.bf16.gmra.mxu0 %vm532_vm2, %v1466_v28  ;;  %v1492_v28 = vor.u32 %v1491_v17, %v1488_v16 }
  0x9f   : > { %v4419_v41 = vpop.f32.mrf.mxu1 }
  0xa2   : > { %v4423_v29 = vpop.f32.mrf.mxu0  ;;  %3603 = vmatmul.msk.bf16.gmra.mxu1 %vm532_vm2, %v4190_v8  ;;  %v1484_v8 = vsel %vm1431_vm4, %v1474_v40, %v1483_v60 }
  0xa3   : > { %3620 = vmatmul.msk.bf16.gmra.mxu2 %vm532_vm2, %v843_v31  ;;  %v1495_v31 = vshrl.u32 %v3919_v38, 16 }
  0xa4   : > { %3707 = vmatmul.msk.bf16.gmra.mxu3 %vm532_vm2, %v1204_v42  ;;  %v1498_v42 = vshll.u32 %v3919_v38, 16 }
  0xa5   : > { %3726 = vmatmul.msk.bf16.gmra.mxu0 %vm532_vm2, %v1475_v45  ;;  %v1497_v50 = vrot.slane %v1495_v31, 1  ;;  %v1211_v31 = vrot.slane %v3920_v47, 1 }
  0xa6   : > { %v4432_v30 = vpop.f32.mrf.mxu2  ;;  %v1500_v51 = vrot.slane %v1498_v42, 2 }
  0xa7   : > { %v4434_v49 = vpop.f32.mrf.mxu3  ;;  %v4436_v53 = vpop.f32.mrf.mxu1 }
  0xaa   : > { %v4438_v54 = vpop.f32.mrf.mxu0 }
  0xae   : > { %v4441_v58 = vpop.f32.mrf.mxu2 }
  0xaf   : > { %v4443_v59 = vpop.f32.mrf.mxu3  ;;  %v4445_v61 = vpop.f32.mrf.mxu1 }
  0xb0   : > { %5583 = vst [vmem:[#allocation5_spill] sm:$0xff] %v4443_v59 }
  0xb2   : > { %v4449_v24 = vpop.f32.mrf.mxu0  ;;  %3604 = vmatmul.msk.bf16.gmra.mxu1 %vm532_vm2, %v4193_v9  ;;  %v1493_v9 = vsel %vm1431_vm4, %v1483_v60, %v1492_v28  ;;  %v1501_v60 = vor.u32 %v1500_v51, %v1497_v50 }
  0xb3   : > { %3621 = vmatmul.msk.bf16.gmra.mxu2 %vm532_vm2, %v845_v62 }
  0xb4   : > { %3708 = vmatmul.msk.bf16.gmra.mxu3 %vm532_vm2, %v1206_v63  ;;  %v849_v63 = vsel %vm834_vm3, %v846_v21, %v848_v26  ;;  %v1507_v21 = vshll.u32 %v3920_v47, 16 }
  0xb5   : > { %3727 = vmatmul.msk.bf16.gmra.mxu0 %vm532_vm2, %v1484_v8 }
  0xb6   : > { %v4458_v2 = vpop.f32.mrf.mxu2  ;;  %v1509_v38 = vrot.slane %v1507_v21, 2 }
  0xb7   : > { %v4460_v4 = vpop.f32.mrf.mxu3  ;;  %v4462_v6 = vpop.f32.mrf.mxu1 }
  0xb8   : > { %5584 = vst [vmem:[#allocation6_spill] sm:$0xff] %v4460_v4 }
  0xba   : > { %v4464_v7 = vpop.f32.mrf.mxu0 }
  0xbe   : > { %v4467_v23 = vpop.f32.mrf.mxu2 }
  0xbf   : > { %v4469_v27 = vpop.f32.mrf.mxu3  ;;  %v4471_v20 = vpop.f32.mrf.mxu1 }
  0xc0   : > { %5585 = vst [vmem:[#allocation7_spill] sm:$0xff] %v4469_v27 }
  0xc2   : > { %v4475_v37 = vpop.f32.mrf.mxu0  ;;  %3605 = vmatmul.msk.bf16.gmra.mxu1 %vm532_vm2, %v4241_v43  ;;  %v1502_v43 = vsel %vm1431_vm4, %v1492_v28, %v1501_v60  ;;  %v850_v28 = vrot.slane %v4196_v10, 1 }
  0xc3   : > { %3622 = vmatmul.msk.bf16.gmra.mxu2 %vm532_vm2, %v847_v34 }
  0xc4   : > { %3709 = vmatmul.msk.bf16.gmra.mxu3 %vm532_vm2, %v1208_v36 }
  0xc5   : > { %3728 = vmatmul.msk.bf16.gmra.mxu0 %vm532_vm2, %v1493_v9 }
  0xc6   : > { %v4484_v39 = vpop.f32.mrf.mxu2 }
  0xc7   : > { %v4486_v40 = vpop.f32.mrf.mxu3  ;;  %v4488_v45 = vpop.f32.mrf.mxu1 }
  0xc8   : > { %5586 = vst [vmem:[#allocation8_spill] sm:$0xff] %v4486_v40 }
  0xca   : > { %v4490_v48 = vpop.f32.mrf.mxu0 }
  0xce   : > { %v4493_v56 = vpop.f32.mrf.mxu2 }
  0xcf   : > { %v4495_v57 = vpop.f32.mrf.mxu3  ;;  %v738_v62 = vpop.f32.mrf.mxu1 }
  0xd0   : > { %5587 = vst [vmem:[#allocation9_spill] sm:$0xff] %v4495_v57  ;;  %v739_v8 = vadd.f32 %v738_v62, %v4423_v29  ;;  %v1504_v29 = vshrl.u32 %v3920_v47, 16  ;;  %v3921_v47 = vld [vmem:[%s4187_s26 + $0x50] sm:$0xff] }
  0xd2   : > { %v4500_v18 = vpop.f32.mrf.mxu0  ;;  %3606 = vmatmul.msk.bf16.gmra.mxu1 %vm532_vm2, %v4196_v10  ;;  %v1506_v9 = vrot.slane %v1504_v29, 1  ;;  %v1513_v29 = vshrl.u32 %v3921_v47, 16 }
  0xd3   : > { %3623 = vmatmul.msk.bf16.gmra.mxu2 %vm532_vm2, %v849_v63  ;;  %v851_v63 = vsel %vm834_vm3, %v848_v26, %v850_v28 }
  0xd4   : > { %3710 = vmatmul.msk.bf16.gmra.mxu3 %vm532_vm2, %v1210_v1  ;;  %v1510_v51 = vor.u32 %v1509_v38, %v1506_v9  ;;  %v1515_v38 = vrot.slane %v1513_v29, 1 }
  0xd5   : > { %3729 = vmatmul.msk.bf16.gmra.mxu0 %vm532_vm2, %v1502_v43 }
  0xd6   : > { %v4509_v16 = vpop.f32.mrf.mxu2  ;;  %v1511_v10 = vsel %vm1431_vm4, %v1501_v60, %v1510_v51 }
  0xd7   : > { %v4511_v17 = vpop.f32.mrf.mxu3  ;;  %v740_v22 = vpop.f32.mrf.mxu1 }
  0xd8   : > { %5588 = vst [vmem:[#allocation10_spill] sm:$0xff] %v4511_v17  ;;  %v741_v34 = vadd.f32 %v740_v22, %v4438_v54  ;;  %v1212_v54 = vsel %vm834_vm3, %v1209_v55, %v1211_v31  ;;  %v1516_v55 = vshll.u32 %v3921_v47, 16 }
  0xda   : > { %v4514_v36 = vpop.f32.mrf.mxu0  ;;  %v1518_v60 = vrot.slane %v1516_v55, 2 }
  0xdc   : > { %v1519_v33 = vor.u32 %v1518_v60, %v1515_v38 }
  0xde   : > { %v4517_v42 = vpop.f32.mrf.mxu2 }
  0xdf   : > { %v4519_v50 = vpop.f32.mrf.mxu3  ;;  %v743_v62 = vpop.f32.mrf.mxu1 }
  0xe0   : > { %5589 = vst [vmem:[#allocation11_spill] sm:$0xff] %v4519_v50  ;;  %v4523_v1 = vadd.f32 %v743_v62, %v4449_v24  ;;  %v852_v62 = vrot.slane %v4199_v11, 1 }
  0xe2   : > { %v4526_v43 = vpop.f32.mrf.mxu0  ;;  %3607 = vmatmul.msk.bf16.gmra.mxu1 %vm532_vm2, %v4199_v11  ;;  %v853_v50 = vsel %vm834_vm3, %v850_v28, %v852_v62  ;;  %v1520_v11 = vsel %vm1431_vm4, %v1510_v51, %v1519_v33  ;;  %v854_v51 = vrot.slane %v4244_v44, 1 }
  0xe3   : > { %3624 = vmatmul.msk.bf16.gmra.mxu2 %vm532_vm2, %v851_v63  ;;  %v1213_v63 = vrot.slane %v3921_v47, 1  ;;  %v3922_v47 = vld [vmem:[%s4187_s26 + $0x58] sm:$0xff] }
  0xe4   : > { %3711 = vmatmul.msk.bf16.gmra.mxu3 %vm532_vm2, %v1212_v54  ;;  %v855_v59 = vsel %vm834_vm3, %v852_v62, %v854_v51 }
  0xe5   : > { %3730 = vmatmul.msk.bf16.gmra.mxu0 %vm532_vm2, %v1511_v10 }
  0xe6   : > { %v4535_v26 = vpop.f32.mrf.mxu2 }
  0xe7   : > { %v4537_v24 = vpop.f32.mrf.mxu3  ;;  %v745_v21 = vpop.f32.mrf.mxu1 }
  0xe8   : > { %5590 = vst [vmem:[#allocation12_spill] sm:$0xff] %v4537_v24  ;;  %v4540_v22 = vadd.f32 %v745_v21, %v4464_v7  ;;  %v1214_v7 = vsel %vm834_vm3, %v1211_v31, %v1213_v63 }
  0xea   : > { %v4542_v9 = vpop.f32.mrf.mxu0 }
  0xee   : > { %v4545_v54 = vpop.f32.mrf.mxu2 }
  0xef   : > { %v4547_v10 = vpop.f32.mrf.mxu3  ;;  %v748_v24 = vpop.f32.mrf.mxu1 }
  0xf0   : > { %5591 = vst [vmem:[#allocation13_spill] sm:$0xff] %v4547_v10  ;;  %v4551_v17 = vadd.f32 %v748_v24, %v4475_v37  ;;  %v1522_v37 = vshrl.u32 %v3922_v47, 16  ;;  %v1525_v24 = vshll.u32 %v3922_v47, 16 }
  0xf2   : > { %v1668_v21 = vpop.f32.mrf.mxu0  ;;  %3608 = vmatmul.msk.bf16.gmra.mxu1 %vm532_vm2, %v4244_v44  ;;  %v1524_v57 = vrot.slane %v1522_v37, 1 }
  0xf3   : > { %3625 = vmatmul.msk.bf16.gmra.mxu2 %vm532_vm2, %v853_v50  ;;  %v1527_v50 = vrot.slane %v1525_v24, 2 }
  0xf4   : > { %3712 = vmatmul.msk.bf16.gmra.mxu3 %vm532_vm2, %v1214_v7  ;;  %v1215_v7 = vrot.slane %v3922_v47, 1 }
  0xf5   : > { %3731 = vmatmul.msk.bf16.gmra.mxu0 %vm532_vm2, %v1520_v11 }
  0xf6   : > { %v938_v29 = vpop.f32.mrf.mxu2 }
  0xf7   : > { %v1028_v28 = vadd.f32 %v938_v29, %v739_v8  ;;  %v1299_v55 = vpop.f32.mrf.mxu3  ;;  %v750_v38 = vpop.f32.mrf.mxu1  ;;  %v1528_v29 = vor.u32 %v1527_v50, %v1524_v57 }
  0xf8   : > { %v4562_v60 = vadd.f32 %v750_v38, %v4490_v48 }
  0xf9   : > { %v1389_v31 = vadd.f32 %v1299_v55, %v1028_v28  ;;  %v1216_v55 = vsel %vm834_vm3, %v1213_v63, %v1215_v7  ;;  %v1529_v44 = vsel %vm1431_vm4, %v1519_v33, %v1528_v29 }
  0xfa   : > { %v1670_v10 = vpop.f32.mrf.mxu0 }
  0xfb   : > { %v4564_v40 = vadd.f32 %v1668_v21, %v1389_v31  ;;  %v856_v31 = vrot.slane %v4278_v14, 1 }
  0xfe   : > { %v940_v11 = vpop.f32.mrf.mxu2 }
  0xff   : > { %v1029_v27 = vadd.f32 %v940_v11, %v741_v34  ;;  %v1301_v8 = vpop.f32.mrf.mxu3  ;;  %v753_v4 = vpop.f32.mrf.mxu1  ;;  %v3923_v34 = vld [vmem:[%s4187_s26 + $0x60] sm:$0xff] }
 0x100   : > { %v4569_v48 = vadd.f32 %v753_v4, %v4500_v18  ;;  %v1531_v18 = vshrl.u32 %v3923_v34, 16  ;;  %v1534_v62 = vshll.u32 %v3923_v34, 16  ;;  %v1217_v50 = vrot.slane %v3923_v34, 1 }
 0x101   : > { %v1390_v28 = vadd.f32 %v1301_v8, %v1029_v27 }
 0x102   : > { %v1673_v37 = vpop.f32.mrf.mxu0  ;;  %3609 = vmatmul.msk.bf16.gmra.mxu1 %vm532_vm2, %v4278_v14  ;;  %v1533_v33 = vrot.slane %v1531_v18, 1  ;;  %v1536_v38 = vrot.slane %v1534_v62, 2 }
 0x103   : > { %3626 = vmatmul.msk.bf16.gmra.mxu2 %vm532_vm2, %v855_v59  ;;  %v4577_v21 = vadd.f32 %v1670_v10, %v1390_v28 }
 0x104   : > { %3713 = vmatmul.msk.bf16.gmra.mxu3 %vm532_vm2, %v1216_v55  ;;  %v1537_v28 = vor.u32 %v1536_v38, %v1533_v33 }
 0x105   : > { %3732 = vmatmul.msk.bf16.gmra.mxu0 %vm532_vm2, %v1529_v44  ;;  %v857_v44 = vsel %vm834_vm3, %v854_v51, %v856_v31 }
 0x106   : > { %v943_v27 = vpop.f32.mrf.mxu2  ;;  %v1538_v14 = vsel %vm1431_vm4, %v1528_v29, %v1537_v28 }
 0x107   : > { %v1030_v4 = vadd.f32 %v943_v27, %v4523_v1  ;;  %v1304_v57 = vpop.f32.mrf.mxu3  ;;  %v755_v63 = vpop.f32.mrf.mxu1 }
 0x108   : > { %v4583_v24 = vadd.f32 %v755_v63, %v4514_v36 }
 0x109   : > { %v1391_v47 = vadd.f32 %v1304_v57, %v1030_v4  ;;  %v1218_v4 = vsel %vm834_vm3, %v1215_v7, %v1217_v50 }
 0x10a   : > { %v1675_v59 = vpop.f32.mrf.mxu0 }
 0x10b   : > { %v4585_v10 = vadd.f32 %v1673_v37, %v1391_v47 }
 0x10e   : > { %v945_v11 = vpop.f32.mrf.mxu2 }
 0x10f   : > { %v1031_v1 = vadd.f32 %v945_v11, %v4540_v22  ;;  %v1306_v8 = vpop.f32.mrf.mxu3  ;;  %v758_v55 = vpop.f32.mrf.mxu1  ;;  %v3924_v22 = vld [vmem:[%s4187_s26 + $0x68] sm:$0xff]  ;;  %v858_v11 = vrot.slane %v4267_v0, 1 }
 0x110   : > { %v4591_v36 = vadd.f32 %v758_v55, %v4526_v43  ;;  %v1540_v7 = vshrl.u32 %v3924_v22, 16  ;;  %v1543_v18 = vshll.u32 %v3924_v22, 16 }
 0x111   : > { %v1392_v27 = vadd.f32 %v1306_v8, %v1031_v1  ;;  %v1219_v1 = vrot.slane %v3924_v22, 1 }
 0x112   : > { %v1678_v37 = vpop.f32.mrf.mxu0  ;;  %3610 = vmatmul.msk.bf16.gmra.mxu1 %vm532_vm2, %v4267_v0  ;;  %v1542_v29 = vrot.slane %v1540_v7, 1  ;;  %v1545_v38 = vrot.slane %v1543_v18, 2 }
 0x113   : > { %3627 = vmatmul.msk.bf16.gmra.mxu2 %vm532_vm2, %v857_v44  ;;  %v4599_v34 = vadd.f32 %v1675_v59, %v1392_v27 }
 0x114   : > { %3714 = vmatmul.msk.bf16.gmra.mxu3 %vm532_vm2, %v1218_v4  ;;  %v1546_v44 = vor.u32 %v1545_v38, %v1542_v29  ;;  %v859_v4 = vsel %vm834_vm3, %v856_v31, %v858_v11 }
 0x115   : > { %3733 = vmatmul.msk.bf16.gmra.mxu0 %vm532_vm2, %v1538_v14  ;;  %v1220_v14 = vsel %vm834_vm3, %v1217_v50, %v1219_v1 }
 0x116   : > { %v948_v51 = vpop.f32.mrf.mxu2  ;;  %v1547_v0 = vsel %vm1431_vm4, %v1537_v28, %v1546_v44 }
 0x117   : > { %v1032_v43 = vadd.f32 %v948_v51, %v4551_v17  ;;  %v1309_v57 = vpop.f32.mrf.mxu3  ;;  %v760_v62 = vpop.f32.mrf.mxu1 }
 0x118   : > { %v4605_v47 = vadd.f32 %v760_v62, %v4542_v9 }
 0x119   : > { %v1393_v63 = vadd.f32 %v1309_v57, %v1032_v43 }
 0x11a   : > { %v1680_v33 = vpop.f32.mrf.mxu0 }
 0x11b   : > { %v4607_v59 = vadd.f32 %v1678_v37, %v1393_v63  ;;  %v3925_v37 = vld [vmem:[%s4187_s26 + $0x70] sm:$0xff] }
 0x11c   : > { %v1549_v50 = vshrl.u32 %v3925_v37, 16  ;;  %v1552_v57 = vshll.u32 %v3925_v37, 16  ;;  %v1221_v38 = vrot.slane %v3925_v37, 1 }
 0x11e   : > { %v950_v8 = vpop.f32.mrf.mxu2  ;;  %v1551_v63 = vrot.slane %v1549_v50, 1  ;;  %v1554_v29 = vrot.slane %v1552_v57, 2 }
 0x11f   : > { %v1033_v17 = vadd.f32 %v950_v8, %v4562_v60  ;;  %v1311_v55 = vpop.f32.mrf.mxu3  ;;  %v4611_v27 = vpop.f32.mrf.mxu1 }
 0x121   : > { %v1394_v9 = vadd.f32 %v1311_v55, %v1033_v17 }
 0x122   : > { %v1683_v51 = vpop.f32.mrf.mxu0  ;;  %3611 = vmatmul.msk.bf16.gmra.mxu1 %vm532_vm2, %v4202_v12 }
 0x123   : > { %3628 = vmatmul.msk.bf16.gmra.mxu2 %vm532_vm2, %v859_v4  ;;  %v4620_v22 = vadd.f32 %v1680_v33, %v1394_v9  ;;  %v860_v33 = vrot.slane %v4202_v12, 1 }
 0x124   : > { %3715 = vmatmul.msk.bf16.gmra.mxu3 %vm532_vm2, %v1220_v14 }
 0x125   : > { %3734 = vmatmul.msk.bf16.gmra.mxu0 %vm532_vm2, %v1547_v0  ;;  %v861_v9 = vsel %vm834_vm3, %v858_v11, %v860_v33  ;;  %v1222_v0 = vsel %vm834_vm3, %v1219_v1, %v1221_v38 }
 0x126   : > { %v953_v60 = vpop.f32.mrf.mxu2 }
 0x127   : > { %v1034_v31 = vadd.f32 %v953_v60, %v4569_v48  ;;  %v1314_v43 = vpop.f32.mrf.mxu3  ;;  %v4625_v7 = vpop.f32.mrf.mxu1  ;;  %v1555_v48 = vor.u32 %v1554_v29, %v1551_v63 }
 0x129   : > { %v1395_v18 = vadd.f32 %v1314_v43, %v1034_v31  ;;  %v1556_v12 = vsel %vm1431_vm4, %v1546_v44, %v1555_v48 }
 0x12a   : > { %v1685_v62 = vpop.f32.mrf.mxu0 }
 0x12b   : > { %v4627_v28 = vadd.f32 %v1683_v51, %v1395_v18  ;;  %v3926_v51 = vld [vmem:[%s4187_s26 + $0x78] sm:$0xff] }
 0x12c   : > { %v1558_v1 = vshrl.u32 %v3926_v51, 16  ;;  %v1561_v43 = vshll.u32 %v3926_v51, 16 }
 0x12e   : > { %v955_v8 = vpop.f32.mrf.mxu2  ;;  %v1560_v63 = vrot.slane %v1558_v1, 1  ;;  %v1563_v29 = vrot.slane %v1561_v43, 2 }
 0x12f   : > { %v1035_v17 = vadd.f32 %v955_v8, %v4583_v24  ;;  %v1316_v55 = vpop.f32.mrf.mxu3  ;;  %v4631_v4 = vpop.f32.mrf.mxu1  ;;  %v1223_v8 = vrot.slane %v3926_v51, 1 }
 0x131   : > { %v1396_v14 = vadd.f32 %v1316_v55, %v1035_v17 }
 0x132   : > { %v1688_v60 = vpop.f32.mrf.mxu0  ;;  %3612 = vmatmul.msk.bf16.gmra.mxu1 %vm532_vm2, %v4205_v13 }
 0x133   : > { %3629 = vmatmul.msk.bf16.gmra.mxu2 %vm532_vm2, %v861_v9  ;;  %v4640_v37 = vadd.f32 %v1685_v62, %v1396_v14  ;;  %v862_v62 = vrot.slane %v4205_v13, 1 }
 0x134   : > { %3716 = vmatmul.msk.bf16.gmra.mxu3 %vm532_vm2, %v1222_v0 }
 0x135   : > { %3735 = vmatmul.msk.bf16.gmra.mxu0 %vm532_vm2, %v1556_v12  ;;  %v863_v0 = vsel %vm834_vm3, %v860_v33, %v862_v62 }
 0x136   : > { %v958_v24 = vpop.f32.mrf.mxu2 }
 0x137   : > { %v1036_v11 = vadd.f32 %v958_v24, %v4591_v36  ;;  %v1319_v31 = vpop.f32.mrf.mxu3  ;;  %v4645_v50 = vpop.f32.mrf.mxu1  ;;  %v1564_v36 = vor.u32 %v1563_v29, %v1560_v63  ;;  %v1224_v24 = vsel %vm834_vm3, %v1221_v38, %v1223_v8 }
 0x139   : > { %v1397_v57 = vadd.f32 %v1319_v31, %v1036_v11  ;;  %v1565_v13 = vsel %vm1431_vm4, %v1555_v48, %v1564_v36 }
 0x13a   : > { %v1690_v18 = vpop.f32.mrf.mxu0 }
 0x13b   : > { %v4647_v44 = vadd.f32 %v1688_v60, %v1397_v57  ;;  %v3927_v60 = vld [vmem:[%s4187_s26 + $0x80] sm:$0xff] }
 0x13c   : > { %v1567_v1 = vshrl.u32 %v3927_v60, 16  ;;  %v1570_v43 = vshll.u32 %v3927_v60, 16 }
 0x13e   : > { %v960_v17 = vpop.f32.mrf.mxu2  ;;  %v1569_v48 = vrot.slane %v1567_v1, 1 }
 0x13f   : > { %v1037_v55 = vadd.f32 %v960_v17, %v4605_v47  ;;  %v1321_v9 = vpop.f32.mrf.mxu3  ;;  %v4651_v14 = vpop.f32.mrf.mxu1  ;;  %v764_v47 = vadd.f32 %v4611_v27, %v4419_v41  ;;  %v1572_v17 = vrot.slane %v1570_v43, 2  ;;  %v766_v41 = vadd.f32 %v4625_v7, %v4436_v53  ;;  %v4682_v53 = vld [vmem:[%s4187_s26 + $0x88] sm:$0xff] }
 0x140   : > { %v1225_v27 = vrot.slane %v3927_v60, 1  ;;  %v1576_v1 = vshrl.u32 %v4682_v53, 16  ;;  %v1579_v43 = vshll.u32 %v4682_v53, 16 }
 0x141   : > { %v1398_v12 = vadd.f32 %v1321_v9, %v1037_v55  ;;  %v864_v55 = vrot.slane %v4248_v46, 1 }
 0x142   : > { %v1693_v11 = vpop.f32.mrf.mxu0  ;;  %3613 = vmatmul.msk.bf16.gmra.mxu1 %vm532_vm2, %v4248_v46 }
 0x143   : > { %3630 = vmatmul.msk.bf16.gmra.mxu2 %vm532_vm2, %v863_v0  ;;  %v4660_v51 = vadd.f32 %v1690_v18, %v1398_v12 }
 0x144   : > { %3717 = vmatmul.msk.bf16.gmra.mxu3 %vm532_vm2, %v1224_v24  ;;  %v1573_v24 = vor.u32 %v1572_v17, %v1569_v48  ;;  %v1578_v48 = vrot.slane %v1576_v1, 1  ;;  %v1581_v17 = vrot.slane %v1579_v43, 2 }
 0x145   : > { %3736 = vmatmul.msk.bf16.gmra.mxu0 %vm532_vm2, %v1565_v13 }
 0x146   : > { %v963_v33 = vpop.f32.mrf.mxu2  ;;  %v1574_v46 = vsel %vm1431_vm4, %v1564_v36, %v1573_v24 }
 0x147   : > { %v1038_v38 = vadd.f32 %v963_v33, %v764_v47  ;;  %v1324_v31 = vpop.f32.mrf.mxu3  ;;  %v4666_v57 = vpop.f32.mrf.mxu1  ;;  %v865_v47 = vsel %vm834_vm3, %v862_v62, %v864_v55  ;;  %v769_v62 = vadd.f32 %v4631_v4, %v4445_v61  ;;  %v866_v61 = vrot.slane %v4281_v15, 1 }
 0x148   : > { %v771_v4 = vadd.f32 %v4645_v50, %v4462_v6  ;;  %v4710_v6 = vld [vmem:[%s4187_s26 + $0x90] sm:$0xff] }
 0x149   : > { %v1399_v63 = vadd.f32 %v1324_v31, %v1038_v38  ;;  %v1226_v38 = vsel %vm834_vm3, %v1223_v8, %v1225_v27  ;;  %v1585_v43 = vshrl.u32 %v4710_v6, 16 }
 0x14a   : > { %v1695_v29 = vpop.f32.mrf.mxu0 }
 0x14b   : > { %v4668_v18 = vadd.f32 %v1693_v11, %v1399_v63 }
 0x14e   : > { %v965_v9 = vpop.f32.mrf.mxu2 }
 0x14f   : > { %v1039_v0 = vadd.f32 %v965_v9, %v766_v41  ;;  %v1326_v12 = vpop.f32.mrf.mxu3  ;;  %v4673_v13 = vpop.f32.mrf.mxu1  ;;  %v1227_v9 = vrot.slane %v4682_v53, 1 }
 0x151   : > { %v1400_v33 = vadd.f32 %v1326_v12, %v1039_v0 }
 0x152   : > { %v1698_v11 = vpop.f32.mrf.mxu0  ;;  %3614 = vmatmul.msk.bf16.gmra.mxu1 %vm532_vm2, %v4281_v15 }
 0x153   : > { %3631 = vmatmul.msk.bf16.gmra.mxu2 %vm532_vm2, %v865_v47  ;;  %v4684_v7 = vadd.f32 %v1695_v29, %v1400_v33  ;;  %v1582_v33 = vor.u32 %v1581_v17, %v1578_v48 }
 0x154   : > { %3718 = vmatmul.msk.bf16.gmra.mxu3 %vm532_vm2, %v1226_v38 }
 0x155   : > { %3737 = vmatmul.msk.bf16.gmra.mxu0 %vm532_vm2, %v1574_v46  ;;  %v867_v46 = vsel %vm834_vm3, %v864_v55, %v866_v61  ;;  %v1583_v15 = vsel %vm1431_vm4, %v1573_v24, %v1582_v33  ;;  %v774_v55 = vadd.f32 %v4651_v14, %v4471_v20  ;;  %v1588_v24 = vshll.u32 %v4710_v6, 16 }
 0x156   : > { %v968_v8 = vpop.f32.mrf.mxu2  ;;  %v868_v14 = vrot.slane %v4313_v52, 1 }
 0x157   : > { %v1040_v60 = vadd.f32 %v968_v8, %v769_v62  ;;  %v1329_v31 = vpop.f32.mrf.mxu3  ;;  %v4692_v63 = vpop.f32.mrf.mxu1  ;;  %v1794_v8 = vld [vmem:[%s4187_s26 + $0x8] sm:$0xc] }
 0x158   : > { %v1798_v53 = vunpack.c.l.b16 %v1794_v8  ;;  %v1229_v8 = vrot.slane %v4710_v6, 1 }
 0x159   : > { %v1401_v36 = vadd.f32 %v1329_v31, %v1040_v60 }
 0x15a   : > { %v1700_v29 = vpop.f32.mrf.mxu0 }
 0x15b   : > { %v4694_v41 = vadd.f32 %v1698_v11, %v1401_v36  ;;  %v1228_v11 = vsel %vm834_vm3, %v1225_v27, %v1227_v9 }
 0x15e   : > { %v970_v0 = vpop.f32.mrf.mxu2 }
 0x15f   : > { %v1041_v12 = vadd.f32 %v970_v0, %v771_v4  ;;  %v1331_v47 = vpop.f32.mrf.mxu3  ;;  %v4700_v38 = vpop.f32.mrf.mxu1  ;;  %v1587_v0 = vrot.slane %v1585_v43, 1  ;;  %v1100_v43 = vld [vmem:[%s4187_s26 + $0x98] sm:$0x1] }
 0x161   : > { %v1402_v62 = vadd.f32 %v1331_v47, %v1041_v12  ;;  %v1590_v12 = vrot.slane %v1588_v24, 2 }
 0x162   : > { %v1703_v60 = vpop.f32.mrf.mxu0  ;;  %3615 = vmatmul.msk.bf16.gmra.mxu1 %vm532_vm2, %v4313_v52  ;;  %v869_v52 = vsel %vm834_vm3, %v866_v61, %v868_v14  ;;  %v779_v61 = vadd.f32 %v4673_v13, %v4432_v30  ;;  %v870_v13 = vrot.slane %v4333_v3, 1 }
 0x163   : > { %3632 = vmatmul.msk.bf16.gmra.mxu2 %vm532_vm2, %v867_v46  ;;  %v4712_v50 = vadd.f32 %v1700_v29, %v1402_v62  ;;  %v5592_v29 = vunpack.c.l.b16 %v4353_v25  ;;  %v1802_v46 = vrot.slane %v4362_v35, 2  ;;  %v1425_v62 = vld [vmem:[%s4187_s26 + $0x98] sm:$0x3]  ;;  %v1230_v35 = vsel %vm834_vm3, %v1227_v9, %v1229_v8 }
 0x164   : > { %3719 = vmatmul.msk.bf16.gmra.mxu3 %vm532_vm2, %v1228_v11  ;;  %v776_v11 = vadd.f32 %v4666_v57, %v4488_v45  ;;  %v1176_v9 = vunpack.c.l.b16 %v1100_v43 }
 0x165   : > { %3738 = vmatmul.msk.bf16.gmra.mxu0 %vm532_vm2, %v1583_v15  ;;  %v1799_v48 = vpack.c.b16 %v5592_v29, %v1798_v53 }
 0x166   : > { %v973_v27 = vpop.f32.mrf.mxu2 }
 0x167   : > { %v1042_v31 = vadd.f32 %v973_v27, %v774_v55  ;;  %v1334_v1 = vpop.f32.mrf.mxu3  ;;  %v4720_v36 = vpop.f32.mrf.mxu1  ;;  %v1801_v47 = vrot.slane %v1799_v48, 2  ;;  %v1591_v55 = vor.u32 %v1590_v12, %v1587_v0  ;;  %v1429_v27 = vunpack.c.l.b16 %v1425_v62  ;;  %v2030_v62 = vld [vmem:[%s4187_s26 + $0x10] sm:$0xc] }
 0x169   : > { %v1403_v17 = vadd.f32 %v1334_v1, %v1042_v31  ;;  %v1803_v31 = vsel %vm1800_vm5, %v1801_v47, %v1802_v46  ;;  %v1592_v45 = vsel %vm1431_vm4, %v1582_v33, %v1591_v55  ;;  %v4741_v57 = vpack.c.b16 %v1429_v27, %v1429_v27 }
 0x16a   : > { %v1705_v4 = vpop.f32.mrf.mxu0  ;;  %v1804_v27 = vrot.slane %v4381_v19, 2 }
 0x16b   : > { %v4724_v20 = vadd.f32 %v1703_v60, %v1403_v17  ;;  %v1594_v0 = vshrl.u32 %v4741_v57, 16  ;;  %v1597_v33 = vshll.u32 %v4741_v57, 16 }
 0x16c   : > { %v1805_v3 = vsel %vm1800_vm5, %v1802_v46, %v1804_v27  ;;  %v784_v46 = vadd.f32 %v4700_v38, %v4458_v2  ;;  %v3072_v38 = vld [vmem:[%s5574_s1] sm:$0xff] }
 0x16e   : > { %v975_v25 = vpop.f32.mrf.mxu2 }
 0x16f   : > { %v1043_v15 = vadd.f32 %v975_v25, %v776_v11  ;;  %v1336_v53 = vpop.f32.mrf.mxu3  ;;  %v4732_v60 = vpop.f32.mrf.mxu1  ;;  %v2031_v11 = vld [vmem:[%s4187_s26 + $0x14] sm:$0xf] }
 0x171   : > { %v1404_v1 = vadd.f32 %v1336_v53, %v1043_v15  ;;  %v1596_v15 = vrot.slane %v1594_v0, 1  ;;  %v1599_v53 = vrot.slane %v1597_v33, 2  ;;  %v4767_v0 = vld [vmem:[%s4187_s26 + $0x18] sm:$0xff] }
 0x172   : > { %v1708_v24 = vpop.f32.mrf.mxu0  ;;  %3742 = vmatmul.msk.bf16.vlgmr.msra.gmra.mxu1 %vm532_vm2, %v1803_v31  ;;  %v2107_v31 = vunpack.c.l.b16 %v2031_v11 }
 0x173   : > { %3633 = vmatmul.msk.bf16.gmra.mxu2 %vm532_vm2, %v869_v52  ;;  %v4743_v6 = vadd.f32 %v1705_v4, %v1404_v1  ;;  %v1195_v4 = vpack.c.b16 %v1176_v9, %v1176_v9  ;;  %v2106_v52 = vunpack.c.l.b16 %v2030_v62  ;;  %v781_v1 = vadd.f32 %v4692_v63, %v4441_v58 }
 0x174   : > { %3720 = vmatmul.msk.bf16.gmra.mxu3 %vm532_vm2, %v1230_v35  ;;  %v1600_v9 = vor.u32 %v1599_v53, %v1596_v15  ;;  %v2410_v62 = vshll.u32 %v4767_v0, 16 }
 0x175   : > { %3739 = vmatmul.msk.bf16.gmra.mxu0 %vm532_vm2, %v1592_v45  ;;  %v1231_v35 = vrot.slane %v1195_v4, 1 }
 0x176   : > { %v978_v29 = vpop.f32.mrf.mxu2  ;;  %v1601_v58 = vsel %vm1431_vm4, %v1591_v55, %v1600_v9  ;;  %v1806_v9 = vrot.slane %v4396_v5, 2  ;;  %v2768_v5 = vrot.slane %v4767_v0, 3 }
 0x177   : > { %v1044_v48 = vadd.f32 %v978_v29, %v779_v61  ;;  %v1339_v17 = vpop.f32.mrf.mxu3  ;;  %v4751_v12 = vpop.f32.mrf.mxu1  ;;  %v1232_v19 = vsel %vm834_vm3, %v1229_v8, %v1231_v35  ;;  %v2407_v8 = vshrl.u32 %v4767_v0, 16 }
 0x179   : > { %v1405_v47 = vadd.f32 %v1339_v17, %v1044_v48  ;;  %v2143_v48 = vpack.c.b16 %v2107_v31, %v2106_v52  ;;  %v2409_v35 = vrot.slane %v2407_v8, 2 }
 0x17a   : > { %v1710_v25 = vpop.f32.mrf.mxu0 }
 0x17b   : > { %v4755_v30 = vadd.f32 %v1708_v24, %v1405_v47  ;;  %v871_v24 = vsel %vm834_vm3, %v868_v14, %v870_v13  ;;  %v2399_v14 = vshrl.u32 %v2143_v48, 16  ;;  %v2760_v47 = vld [vmem:[%s4187_s26 + $0x10] sm:$0x8]  ;;  %v2402_v4 = vshll.u32 %v2143_v48, 16 }
 0x17c   : > { %v2764_v55 = vunpack.c.l.b16 %v2760_v47 }
 0x17d   : > { %v2401_v13 = vrot.slane %v2399_v14, 2 }
 0x17e   : > { %v980_v43 = vpop.f32.mrf.mxu2  ;;  %v2765_v2 = vpack.c.b16 %v2107_v31, %v2764_v55 }
 0x17f   : > { %v1045_v45 = vadd.f32 %v980_v43, %v781_v1  ;;  %v1341_v61 = vpop.f32.mrf.mxu3  ;;  %v4761_v29 = vpop.f32.mrf.mxu1  ;;  %v2404_v1 = vrot.slane %v2402_v4, 3  ;;  %v2412_v43 = vrot.slane %v2410_v62, 3  ;;  %v1807_v4 = vsel %vm1800_vm5, %v1804_v27, %v1806_v9  ;;  %v4799_v62 = vld [vmem:[%s4187_s26 + $0x20] sm:$0xff] }
 0x180   : > { %v789_v27 = vadd.f32 %v4732_v60, %v4484_v39  ;;  %v2419_v55 = vshll.u32 %v4799_v62, 16  ;;  %v3074_v60 = vld [vmem:[%s5574_s1 + $0x10] sm:$0xff] }
 0x181   : > { %v1406_v17 = vadd.f32 %v1341_v61, %v1045_v45  ;;  %v2413_v31 = vor.u32 %v2412_v43, %v2409_v35 }
 0x182   : > { %v1713_v33 = vpop.f32.mrf.mxu0  ;;  %3743 = vmatmul.msk.bf16.gmra.mxu1 %vm532_vm2, %v1805_v3  ;;  %v2163_v3 = vrot.slane %v4767_v0, 2 }
 0x183   : > { %3634 = vmatmul.msk.bf16.gmra.mxu2 %vm532_vm2, %v871_v24  ;;  %v4772_v63 = vadd.f32 %v1710_v25, %v1406_v17  ;;  %v2162_v24 = vrot.slane %v2143_v48, 2  ;;  %v4082_v17 = vmov 0  }
 0x184   : > { %3721 = vmatmul.msk.bf16.gmra.mxu3 %vm532_vm2, %v1232_v19  ;;  %4000 = vset.pattern.permute.xlu0 %v4082_v17  ;;  %v786_v19 = vadd.f32 %v4720_v36, %v4467_v23 }
 0x185   : > { %3740 = vmatmul.msk.bf16.gmra.mxu0 %vm532_vm2, %v1601_v58  ;;  %4001 = vset.pattern.permute.xlu1 %v4082_v17  ;;  %v2405_v58 = vor.u32 %v2404_v1, %v2401_v13  ;;  %v2164_v8 = vsel %vm1800_vm5, %v2162_v24, %v2163_v3 }
 0x186   : > { %v983_v11 = vpop.f32.mrf.mxu2  ;;  %3110 = vperm.xlu0 %4000, %v3072_v38   ;;  %4002 = vset.pattern.permute.xlu2 %v4082_v17  ;;  %v2421_v38 = vrot.slane %v2419_v55, 3  ;;  %v1808_v17 = vrot.slane %v4411_v32, 2 }
 0x187   : > { %v1046_v15 = vadd.f32 %v983_v11, %v784_v46  ;;  %v1344_v53 = vpop.f32.mrf.mxu3  ;;  %v4781_v25 = vpop.f32.mrf.mxu1  ;;  %v2767_v46 = vrot.slane %v2765_v2, 3  ;;  %v2414_v36 = vsel %vm2397_vm6, %v2405_v58, %v2413_v31  ;;  %3120 = vperm.xlu1 %4001, %v3074_v60   ;;  %v791_v58 = vadd.f32 %v4751_v12, %v4493_v56 }
 0x189   : > { %v1407_v52 = vadd.f32 %v1344_v53, %v1046_v15  ;;  %v2769_v15 = vsel %vm2766_vm7, %v2767_v46, %v2768_v5  ;;  %v2416_v53 = vshrl.u32 %v4799_v62, 16 }
 0x18a   : > { %v1715_v45 = vpop.f32.mrf.mxu0 }
 0x18b   : > { %v4786_v61 = vadd.f32 %v1713_v33, %v1407_v52  ;;  %v3073_v52 = vld [vmem:[%s5574_s1 + $0x8] sm:$0xff]  ;;  %v2418_v2 = vrot.slane %v2416_v53, 2  ;;  %v3075_v53 = vld [vmem:[%s5574_s1 + $0x18] sm:$0xff] }
 0x18e   : > { %v985_v14 = vpop.f32.mrf.mxu2  ;;  %3115 = vperm.xlu0 %4000, %v3073_v52  }
 0x18f   : > { %v1047_v33 = vadd.f32 %v985_v14, %v786_v19  ;;  %v1346_v47 = vpop.f32.mrf.mxu3  ;;  %v4793_v48 = vpop.f32.mrf.mxu1  ;;  %v2165_v19 = vrot.slane %v4799_v62, 2  ;;  %v2422_v14 = vor.u32 %v2421_v38, %v2418_v2  ;;  %3125 = vperm.xlu1 %4001, %v3075_v53  }
 0x191   : > { %v1408_v23 = vadd.f32 %v1346_v47, %v1047_v33  ;;  %v2423_v32 = vsel %vm2397_vm6, %v2413_v31, %v2422_v14 }
 0x192   : > { %v1718_v11 = vpop.f32.mrf.mxu0  ;;  %3744 = vmatmul.msk.bf16.gmra.mxu1 %vm532_vm2, %v1807_v4  ;;  %v2770_v4 = vrot.slane %v4799_v62, 3 }
 0x193   : > { %3829 = vmatmul.msk.bf16.vlgmr.msra.gmra.mxu2 %vm532_vm2, %v2164_v8  ;;  %v4804_v0 = vadd.f32 %v1715_v45, %v1408_v23  ;;  %v1809_v23 = vsel %vm1800_vm5, %v1806_v9, %v1808_v17  ;;  %v794_v9 = vadd.f32 %v4761_v29, %v4509_v16 }
 0x194   : > { %3848 = vmatmul.msk.bf16.vlgmr.msra.gmra.mxu3 %vm532_vm2, %v2414_v36  ;;  %v2166_v36 = vsel %vm1800_vm5, %v2163_v3, %v2165_v19  ;;  %v2771_v56 = vsel %vm2766_vm7, %v2768_v5, %v2770_v4 }
 0x195   : > { %3867 = vmatmul.msk.bf16.vlgmr.msra.gmra.mxu0 %vm532_vm2, %v2769_v15  ;;  %v4833_v15 = vld [vmem:[%s4187_s26 + $0x28] sm:$0xff] }
 0x196   : > { %v988_v13 = vpop.f32.mrf.mxu2  ;;  %v2425_v3 = vshrl.u32 %v4833_v15, 16  ;;  %v2428_v31 = vshll.u32 %v4833_v15, 16  ;;  %v2167_v38 = vrot.slane %v4833_v15, 2 }
 0x197   : > { %v1048_v1 = vadd.f32 %v988_v13, %v789_v27  ;;  %v1349_v35 = vpop.f32.mrf.mxu3  ;;  %v4815_v43 = vpop.f32.mrf.mxu1 }
 0x199   : > { %v1409_v45 = vadd.f32 %v1349_v35, %v1048_v1  ;;  %v2427_v1 = vrot.slane %v2425_v3, 2  ;;  %v2430_v35 = vrot.slane %v2428_v31, 3 }
 0x19a   : > { %v1720_v39 = vpop.f32.mrf.mxu0 }
 0x19b   : > { %v4820_v24 = vadd.f32 %v1718_v11, %v1409_v45  ;;  %v4004_v45 = vld [vmem:[%s4187_s26 + $0x30] sm:$0xff]  ;;  %v2431_v60 = vor.u32 %v2430_v35, %v2427_v1 }
 0x19c   : > { %v1810_v2 = vrot.slane %v4004_v45, 2 }
 0x19e   : > { %v990_v33 = vpop.f32.mrf.mxu2 }
 0x19f   : > { %v1049_v47 = vadd.f32 %v990_v33, %v791_v58  ;;  %v1351_v46 = vpop.f32.mrf.mxu3  ;;  %v4827_v8 = vpop.f32.mrf.mxu1 }
 0x1a1   : > { %v1410_v11 = vadd.f32 %v1351_v46, %v1049_v47  ;;  %v2772_v46 = vrot.slane %v4833_v15, 3 }
 0x1a2   : > { %v1723_v27 = vpop.f32.mrf.mxu0  ;;  %3745 = vmatmul.msk.bf16.gmra.mxu1 %vm532_vm2, %v1809_v23 }
 0x1a3   : > { %3830 = vmatmul.msk.bf16.gmra.mxu2 %vm532_vm2, %v2166_v36  ;;  %v4838_v12 = vadd.f32 %v1720_v39, %v1410_v11  ;;  %v796_v39 = vadd.f32 %v4781_v25, %v4517_v42  ;;  %v1811_v36 = vsel %vm1800_vm5, %v1808_v17, %v1810_v2  ;;  %v2168_v11 = vsel %vm1800_vm5, %v2165_v19, %v2167_v38 }
 0x1a4   : > { %3849 = vmatmul.msk.bf16.gmra.mxu3 %vm532_vm2, %v2423_v32  ;;  %v2773_v42 = vsel %vm2766_vm7, %v2770_v4, %v2772_v46  ;;  %v799_v17 = vadd.f32 %v4793_v48, %v4535_v26  ;;  %v4005_v48 = vld [vmem:[%s4187_s26 + $0x38] sm:$0xff] }
 0x1a5   : > { %3868 = vmatmul.msk.bf16.gmra.mxu0 %vm532_vm2, %v2771_v56  ;;  %v4864_v56 = vld [vmem:[%s4187_s26 + $0x30] sm:$0xff]  ;;  %v1812_v1 = vrot.slane %v4005_v48, 2  ;;  %v3077_v48 = vld [vmem:[%s5574_s1 + $0x28] sm:$0xff] }
 0x1a6   : > { %v993_v62 = vpop.f32.mrf.mxu2  ;;  %v2434_v19 = vshrl.u32 %v4864_v56, 16  ;;  %v2169_v35 = vrot.slane %v4864_v56, 2 }
 0x1a7   : > { %v1050_v5 = vadd.f32 %v993_v62, %v794_v9  ;;  %v1354_v55 = vpop.f32.mrf.mxu3  ;;  %v4849_v13 = vpop.f32.mrf.mxu1 }
 0x1a8   : > { %v2436_v53 = vrot.slane %v2434_v19, 2  ;;  %v3076_v19 = vld [vmem:[%s5574_s1 + $0x20] sm:$0xff] }
 0x1a9   : > { %v1411_v52 = vadd.f32 %v1354_v55, %v1050_v5  ;;  %3130 = vperm.xlu2 %4002, %v3076_v19   ;;  %v5594_v19 = vld [vmem:[#allocation6_spill] sm:$0xff] }
 0x1aa   : > { %v1725_v16 = vpop.f32.mrf.mxu0 }
 0x1ab   : > { %v4851_v29 = vadd.f32 %v1723_v27, %v1411_v52  ;;  %v2432_v27 = vsel %vm2397_vm6, %v2422_v14, %v2431_v60  ;;  %v2437_v14 = vshll.u32 %v4864_v56, 16  ;;  %v3078_v52 = vld [vmem:[%s5574_s1 + $0x30] sm:$0xff] }
 0x1ac   : > { %3140 = vperm.xlu0 %4000, %v3078_v52  }
 0x1ad   : > { %v2439_v5 = vrot.slane %v2437_v14, 3 }
 0x1ae   : > { %v995_v58 = vpop.f32.mrf.mxu2 }
 0x1af   : > { %v1051_v33 = vadd.f32 %v995_v58, %v796_v39  ;;  %v1356_v47 = vpop.f32.mrf.mxu3  ;;  %v4858_v23 = vpop.f32.mrf.mxu1  ;;  %v2440_v45 = vor.u32 %v2439_v5, %v2436_v53  ;;  %v4006_v5 = vld [vmem:[%s4187_s26 + $0x40] sm:$0xff] }
 0x1b1   : > { %v1412_v32 = vadd.f32 %v1356_v47, %v1051_v33  ;;  %v2774_v47 = vrot.slane %v4864_v56, 3  ;;  %3135 = vperm.xlu2 %4002, %v3077_v48  }
 0x1b2   : > { %v1728_v9 = vpop.f32.mrf.mxu0  ;;  %3746 = vmatmul.msk.bf16.gmra.mxu1 %vm532_vm2, %v1811_v36 }
 0x1b3   : > { %3831 = vmatmul.msk.bf16.gmra.mxu2 %vm532_vm2, %v2168_v11  ;;  %v4869_v25 = vadd.f32 %v1725_v16, %v1412_v32  ;;  %v801_v16 = vadd.f32 %v4815_v43, %v4545_v54  ;;  %v1813_v11 = vsel %vm1800_vm5, %v1810_v2, %v1812_v1  ;;  %v2170_v32 = vsel %vm1800_vm5, %v2167_v38, %v2169_v35 }
 0x1b4   : > { %3850 = vmatmul.msk.bf16.gmra.mxu3 %vm532_vm2, %v2432_v27  ;;  %v2775_v54 = vsel %vm2766_vm7, %v2772_v46, %v2774_v47  ;;  %v804_v2 = vadd.f32 %v4827_v8, %v4434_v49  ;;  %v3079_v46 = vld [vmem:[%s5574_s1 + $0x38] sm:$0xff] }
 0x1b5   : > { %3869 = vmatmul.msk.bf16.gmra.mxu0 %vm532_vm2, %v2773_v42  ;;  %v4895_v42 = vld [vmem:[%s4187_s26 + $0x38] sm:$0xff]  ;;  %3145 = vperm.xlu1 %4001, %v3079_v46  }
 0x1b6   : > { %v998_v15 = vpop.f32.mrf.mxu2  ;;  %v2443_v38 = vshrl.u32 %v4895_v42, 16  ;;  %v2171_v52 = vrot.slane %v4895_v42, 2 }
 0x1b7   : > { %v1052_v3 = vadd.f32 %v998_v15, %v799_v17  ;;  %v1359_v31 = vpop.f32.mrf.mxu3  ;;  %v4877_v62 = vpop.f32.mrf.mxu1 }
 0x1b9   : > { %v1413_v4 = vadd.f32 %v1359_v31, %v1052_v3  ;;  %v2445_v3 = vrot.slane %v2443_v38, 2 }
 0x1ba   : > { %v1730_v55 = vpop.f32.mrf.mxu0 }
 0x1bb   : > { %v4882_v26 = vadd.f32 %v1728_v9, %v1413_v4  ;;  %v2441_v9 = vsel %vm2397_vm6, %v2431_v60, %v2440_v45  ;;  %v2446_v60 = vshll.u32 %v4895_v42, 16 }
 0x1bd   : > { %v2448_v31 = vrot.slane %v2446_v60, 3  ;;  %v4932_v60 = vld [vmem:[%s4187_s26 + $0x40] sm:$0xff] }
 0x1be   : > { %v1000_v39 = vpop.f32.mrf.mxu2 }
 0x1bf   : > { %v1053_v58 = vadd.f32 %v1000_v39, %v801_v16  ;;  %v1361_v33 = vpop.f32.mrf.mxu3  ;;  %v4889_v36 = vpop.f32.mrf.mxu1  ;;  %v5593_v16 = vld [vmem:[#allocation5_spill] sm:$0xff] }
 0x1c0   : > { %v806_v39 = vadd.f32 %v4849_v13, %v5593_v16  ;;  %v4007_v16 = vld [vmem:[%s4187_s26 + $0x48] sm:$0xff] }
 0x1c1   : > { %v1414_v27 = vadd.f32 %v1361_v33, %v1053_v58  ;;  %v2449_v58 = vor.u32 %v2448_v31, %v2445_v3 }
 0x1c2   : > { %v1733_v17 = vpop.f32.mrf.mxu0  ;;  %3747 = vmatmul.msk.bf16.gmra.mxu1 %vm532_vm2, %v1813_v11 }
 0x1c3   : > { %3832 = vmatmul.msk.bf16.gmra.mxu2 %vm532_vm2, %v2170_v32  ;;  %v4900_v43 = vadd.f32 %v1730_v55, %v1414_v27  ;;  %v1814_v55 = vrot.slane %v4006_v5, 2  ;;  %v2776_v27 = vrot.slane %v4895_v42, 3  ;;  %v2450_v38 = vsel %vm2397_vm6, %v2440_v45, %v2449_v58  ;;  %v3082_v5 = vld [vmem:[%s5574_s1 + $0x50] sm:$0xff] }
 0x1c4   : > { %3851 = vmatmul.msk.bf16.gmra.mxu3 %vm532_vm2, %v2441_v9  ;;  %v2455_v45 = vshll.u32 %v4932_v60, 16  ;;  %3160 = vperm.xlu1 %4001, %v3082_v5  }
 0x1c5   : > { %3870 = vmatmul.msk.bf16.gmra.mxu0 %vm532_vm2, %v2775_v54  ;;  %v2172_v54 = vsel %vm1800_vm5, %v2169_v35, %v2171_v52  ;;  %v2777_v13 = vsel %vm2766_vm7, %v2774_v47, %v2776_v27  ;;  %v2452_v35 = vshrl.u32 %v4932_v60, 16 }
 0x1c6   : > { %v1003_v56 = vpop.f32.mrf.mxu2 }
 0x1c7   : > { %v1054_v14 = vadd.f32 %v1003_v56, %v804_v2  ;;  %v1364_v15 = vpop.f32.mrf.mxu3  ;;  %v4914_v49 = vpop.f32.mrf.mxu1  ;;  %v2454_v31 = vrot.slane %v2452_v35, 2 }
 0x1c9   : > { %v1415_v8 = vadd.f32 %v1364_v15, %v1054_v14  ;;  %v3081_v14 = vld [vmem:[%s5574_s1 + $0x48] sm:$0xff] }
 0x1ca   : > { %v1735_v4 = vpop.f32.mrf.mxu0  ;;  %3155 = vperm.xlu0 %4000, %v3081_v14  }
 0x1cb   : > { %v4916_v53 = vadd.f32 %v1733_v17, %v1415_v8  ;;  %v1815_v17 = vsel %vm1800_vm5, %v1812_v1, %v1814_v55  ;;  %v809_v1 = vadd.f32 %v4858_v23, %v5594_v19  ;;  %v2457_v23 = vrot.slane %v2455_v45, 3 }
 0x1ce   : > { %v1005_v33 = vpop.f32.mrf.mxu2 }
 0x1cf   : > { %v1055_v11 = vadd.f32 %v1005_v33, %v806_v39  ;;  %v1366_v32 = vpop.f32.mrf.mxu3  ;;  %v4926_v9 = vpop.f32.mrf.mxu1  ;;  %v1816_v39 = vrot.slane %v4007_v16, 2  ;;  %v2173_v33 = vrot.slane %v4932_v60, 2 }
 0x1d1   : > { %v1416_v2 = vadd.f32 %v1366_v32, %v1055_v11  ;;  %v5595_v11 = vld [vmem:[#allocation7_spill] sm:$0xff] }
 0x1d2   : > { %v1738_v56 = vpop.f32.mrf.mxu0  ;;  %3748 = vmatmul.msk.bf16.gmra.mxu1 %vm532_vm2, %v1815_v17  ;;  %v811_v32 = vadd.f32 %v4877_v62, %v5595_v11  ;;  %v2458_v17 = vor.u32 %v2457_v23, %v2454_v31  ;;  %v3084_v11 = vld [vmem:[%s5574_s1 + $0x60] sm:$0xff] }
 0x1d3   : > { %3833 = vmatmul.msk.bf16.gmra.mxu2 %vm532_vm2, %v2172_v54  ;;  %v4937_v42 = vadd.f32 %v1735_v4, %v1416_v2  ;;  %3170 = vperm.xlu0 %4000, %v3084_v11  }
 0x1d4   : > { %3852 = vmatmul.msk.bf16.gmra.mxu3 %vm532_vm2, %v2450_v38  ;;  %v2459_v45 = vsel %vm2397_vm6, %v2449_v58, %v2458_v17 }
 0x1d5   : > { %3871 = vmatmul.msk.bf16.gmra.mxu0 %vm532_vm2, %v2777_v13  ;;  %v2778_v13 = vrot.slane %v4932_v60, 3  ;;  %v5596_v60 = vld [vmem:[#allocation8_spill] sm:$0xff] }
 0x1d6   : > { %v1008_v46 = vpop.f32.mrf.mxu2 }
 0x1d7   : > { %v1056_v47 = vadd.f32 %v1008_v46, %v809_v1  ;;  %v1369_v15 = vpop.f32.mrf.mxu3  ;;  %v4948_v8 = vpop.f32.mrf.mxu1  ;;  %v2174_v1 = vsel %vm1800_vm5, %v2171_v52, %v2173_v33  ;;  %v4966_v46 = vld [vmem:[%s4187_s26 + $0x48] sm:$0xff]  ;;  %v2779_v62 = vsel %vm2766_vm7, %v2776_v27, %v2778_v13 }
 0x1d8   : > { %v2461_v52 = vshrl.u32 %v4966_v46, 16  ;;  %v2464_v58 = vshll.u32 %v4966_v46, 16 }
 0x1d9   : > { %v1417_v3 = vadd.f32 %v1369_v15, %v1056_v47 }
 0x1da   : > { %v1740_v4 = vpop.f32.mrf.mxu0  ;;  %v2463_v5 = vrot.slane %v2461_v52, 2 }
 0x1db   : > { %v4953_v48 = vadd.f32 %v1738_v56, %v1417_v3  ;;  %v1817_v56 = vsel %vm1800_vm5, %v1814_v55, %v1816_v39  ;;  %v814_v55 = vadd.f32 %v4889_v36, %v5596_v60  ;;  %v3080_v3 = vld [vmem:[%s5574_s1 + $0x40] sm:$0xff]  ;;  %v2466_v36 = vrot.slane %v2464_v58, 3 }
 0x1dc   : > { %3150 = vperm.xlu2 %4002, %v3080_v3  }
 0x1de   : > { %v1010_v54 = vpop.f32.mrf.mxu2 }
 0x1df   : > { %v1057_v2 = vadd.f32 %v1010_v54, %v811_v32  ;;  %v1371_v38 = vpop.f32.mrf.mxu3  ;;  %v4960_v19 = vpop.f32.mrf.mxu1  ;;  %v4008_v54 = vld [vmem:[%s4187_s26 + $0x50] sm:$0xff] }
 0x1e1   : > { %v1418_v35 = vadd.f32 %v1371_v38, %v1057_v2  ;;  %v1818_v2 = vrot.slane %v4008_v54, 2  ;;  %v2175_v38 = vrot.slane %v4966_v46, 2 }
 0x1e2   : > { %v1743_v14 = vpop.f32.mrf.mxu0  ;;  %3749 = vmatmul.msk.bf16.gmra.mxu1 %vm532_vm2, %v1817_v56  ;;  %v5597_v56 = vld [vmem:[#allocation9_spill] sm:$0xff] }
 0x1e3   : > { %3834 = vmatmul.msk.bf16.gmra.mxu2 %vm532_vm2, %v2174_v1  ;;  %v4971_v47 = vadd.f32 %v1740_v4, %v1418_v35  ;;  %v816_v1 = vadd.f32 %v4914_v49, %v5597_v56  ;;  %v2467_v35 = vor.u32 %v2466_v36, %v2463_v5  ;;  %v1819_v58 = vsel %vm1800_vm5, %v1816_v39, %v1818_v2  ;;  %v5598_v39 = vld [vmem:[#allocation10_spill] sm:$0xff] }
 0x1e4   : > { %3853 = vmatmul.msk.bf16.gmra.mxu3 %vm532_vm2, %v2459_v45  ;;  %v3085_v36 = vld [vmem:[%s5574_s1 + $0x68] sm:$0xff] }
 0x1e5   : > { %3872 = vmatmul.msk.bf16.gmra.mxu0 %vm532_vm2, %v2779_v62  ;;  %3175 = vperm.xlu1 %4001, %v3085_v36  }
 0x1e6   : > { %v1013_v15 = vpop.f32.mrf.mxu2 }
 0x1e7   : > { %v1058_v27 = vadd.f32 %v1013_v15, %v814_v55  ;;  %v1374_v31 = vpop.f32.mrf.mxu3  ;;  %v4982_v23 = vpop.f32.mrf.mxu1  ;;  %v2780_v55 = vrot.slane %v4966_v46, 3 }
 0x1e9   : > { %v1419_v4 = vadd.f32 %v1374_v31, %v1058_v27  ;;  %v2468_v27 = vsel %vm2397_vm6, %v2458_v17, %v2467_v35  ;;  %v5001_v31 = vld [vmem:[%s4187_s26 + $0x50] sm:$0xff]  ;;  %v2781_v46 = vsel %vm2766_vm7, %v2778_v13, %v2780_v55 }
 0x1ea   : > { %v1745_v16 = vpop.f32.mrf.mxu0  ;;  %v2473_v17 = vshll.u32 %v5001_v31, 16 }
 0x1eb   : > { %v4987_v32 = vadd.f32 %v1743_v14, %v1419_v4  ;;  %v2176_v14 = vsel %vm1800_vm5, %v2173_v33, %v2175_v38  ;;  %v819_v33 = vadd.f32 %v4926_v9, %v5598_v39 }
 0x1ee   : > { %v1015_v45 = vpop.f32.mrf.mxu2 }
 0x1ef   : > { %v1059_v62 = vadd.f32 %v1015_v45, %v816_v1  ;;  %v1376_v60 = vpop.f32.mrf.mxu3  ;;  %v1904_v52 = vpop.f32.mrf.mxu1  ;;  %v2475_v1 = vrot.slane %v2473_v17, 3 }
 0x1f0   : > { %v4997_v3 = vadd.f32 %v1904_v52, %v4564_v40  ;;  %v2470_v40 = vshrl.u32 %v5001_v31, 16  ;;  %v4009_v52 = vld [vmem:[%s4187_s26 + $0x58] sm:$0xff] }
 0x1f1   : > { %v1420_v15 = vadd.f32 %v1376_v60, %v1059_v62  ;;  %v3083_v62 = vld [vmem:[%s5574_s1 + $0x58] sm:$0xff] }
 0x1f2   : > { %v1748_v49 = vpop.f32.mrf.mxu0  ;;  %3750 = vmatmul.msk.bf16.gmra.mxu1 %vm532_vm2, %v1819_v58  ;;  %v2472_v9 = vrot.slane %v2470_v40, 2  ;;  %v1820_v58 = vrot.slane %v4009_v52, 2  ;;  %3165 = vperm.xlu2 %4002, %v3083_v62   ;;  %v2782_v40 = vrot.slane %v5001_v31, 3 }
 0x1f3   : > { %3835 = vmatmul.msk.bf16.gmra.mxu2 %vm532_vm2, %v2176_v14  ;;  %v5006_v4 = vadd.f32 %v1745_v16, %v1420_v15  ;;  %v2177_v14 = vrot.slane %v5001_v31, 2  ;;  %v5599_v15 = vld [vmem:[#allocation11_spill] sm:$0xff] }
 0x1f4   : > { %3854 = vmatmul.msk.bf16.gmra.mxu3 %vm532_vm2, %v2468_v27  ;;  %v821_v27 = vadd.f32 %v4948_v8, %v5599_v15  ;;  %v2783_v31 = vsel %vm2766_vm7, %v2780_v55, %v2782_v40 }
 0x1f5   : > { %3873 = vmatmul.msk.bf16.gmra.mxu0 %vm532_vm2, %v2781_v46 }
 0x1f6   : > { %v1018_v5 = vpop.f32.mrf.mxu2 }
 0x1f7   : > { %v1060_v13 = vadd.f32 %v1018_v5, %v819_v33  ;;  %v1379_v16 = vpop.f32.mrf.mxu3  ;;  %v1906_v11 = vpop.f32.mrf.mxu1  ;;  %v1821_v5 = vsel %vm1800_vm5, %v1818_v2, %v1820_v58 }
 0x1f8   : > { %v5018_v56 = vadd.f32 %v1906_v11, %v4577_v21  ;;  %v2476_v21 = vor.u32 %v2475_v1, %v2472_v9  ;;  %v5037_v11 = vld [vmem:[%s4187_s26 + $0x58] sm:$0xff] }
 0x1f9   : > { %v1421_v54 = vadd.f32 %v1379_v16, %v1060_v13  ;;  %v3087_v1 = vld [vmem:[%s5574_s1 + $0x78] sm:$0xff] }
 0x1fa   : > { %v1750_v45 = vpop.f32.mrf.mxu0  ;;  %v2477_v16 = vsel %vm2397_vm6, %v2467_v35, %v2476_v21  ;;  %v2482_v35 = vshll.u32 %v5037_v11, 16  ;;  %3185 = vperm.xlu0 %4000, %v3087_v1  }
 0x1fb   : > { %v5023_v60 = vadd.f32 %v1748_v49, %v1421_v54  ;;  %v2178_v49 = vsel %vm1800_vm5, %v2175_v38, %v2177_v14  ;;  %v5600_v38 = vld [vmem:[#allocation12_spill] sm:$0xff] }
 0x1fc   : > { %v824_v54 = vadd.f32 %v4960_v19, %v5600_v38 }
 0x1fe   : > { %v1020_v46 = vpop.f32.mrf.mxu2 }
 0x1ff   : > { %v1061_v39 = vadd.f32 %v1020_v46, %v821_v27  ;;  %v1381_v33 = vpop.f32.mrf.mxu3  ;;  %v1909_v17 = vpop.f32.mrf.mxu1  ;;  %v2484_v27 = vrot.slane %v2482_v35, 3 }
 0x200   : > { %v5033_v13 = vadd.f32 %v1909_v17, %v4585_v10  ;;  %v2479_v10 = vshrl.u32 %v5037_v11, 16 }
 0x201   : > { %v1422_v36 = vadd.f32 %v1381_v33, %v1061_v39  ;;  %v4010_v33 = vld [vmem:[%s4187_s26 + $0x60] sm:$0xff] }
 0x202   : > { %v1753_v8 = vpop.f32.mrf.mxu0  ;;  %3751 = vmatmul.msk.bf16.gmra.mxu1 %vm532_vm2, %v1821_v5  ;;  %v2481_v19 = vrot.slane %v2479_v10, 2  ;;  %v1822_v17 = vrot.slane %v4010_v33, 2  ;;  %v2179_v5 = vrot.slane %v5037_v11, 2 }
 0x203   : > { %3836 = vmatmul.msk.bf16.gmra.mxu2 %vm532_vm2, %v2178_v49  ;;  %v5043_v2 = vadd.f32 %v1750_v45, %v1422_v36  ;;  %v3088_v49 = vld [vmem:[%s5574_s1 + $0x80] sm:$0xff] }
 0x204   : > { %3855 = vmatmul.msk.bf16.gmra.mxu3 %vm532_vm2, %v2477_v16  ;;  %v5601_v36 = vld [vmem:[#allocation13_spill] sm:$0xff]  ;;  %3190 = vperm.xlu1 %4001, %v3088_v49   ;;  %v1823_v35 = vsel %vm1800_vm5, %v1820_v58, %v1822_v17 }
 0x205   : > { %3874 = vmatmul.msk.bf16.gmra.mxu0 %vm532_vm2, %v2783_v31  ;;  %v826_v16 = vadd.f32 %v4982_v23, %v5601_v36  ;;  %v2485_v31 = vor.u32 %v2484_v27, %v2481_v19  ;;  %v3948_v58 = vld [vmem:[%s5577_s4 + $0x8] sm:$0xff] }
 0x206   : > { %v1023_v9 = vpop.f32.mrf.mxu2  ;;  %3430 = vmatpush.bf16.msrb.mxu1 %v3948_v58 }
 0x207   : > { %v1062_v55 = vadd.f32 %v1023_v9, %v824_v54  ;;  %v1384_v62 = vpop.f32.mrf.mxu3  ;;  %v1911_v45 = vpop.f32.mrf.mxu1  ;;  %v2180_v9 = vsel %vm1800_vm5, %v2177_v14, %v2179_v5 }
 0x208   : > { %v5054_v15 = vadd.f32 %v1911_v45, %v4599_v34  ;;  %v5073_v45 = vld [vmem:[%s4187_s26 + $0x60] sm:$0xff] }
 0x209   : > { %v1423_v52 = vadd.f32 %v1384_v62, %v1062_v55  ;;  %v2486_v62 = vsel %vm2397_vm6, %v2476_v21, %v2485_v31  ;;  %v2491_v21 = vshll.u32 %v5073_v45, 16 }
 0x20a   : > { %v1755_v46 = vpop.f32.mrf.mxu0 }
 0x20b   : > { %v5056_v39 = vadd.f32 %v1753_v8, %v1423_v52  ;;  %v2784_v8 = vrot.slane %v5037_v11, 3 }
 0x20d   : > { %v2785_v11 = vsel %vm2766_vm7, %v2782_v40, %v2784_v8  ;;  %v3086_v40 = vld [vmem:[%s5574_s1 + $0x70] sm:$0xff] }
 0x20e   : > { %v1025_v34 = vpop.f32.mrf.mxu2  ;;  %3180 = vperm.xlu2 %4002, %v3086_v40  }
 0x20f   : > { %v1063_v38 = vadd.f32 %v1025_v34, %v826_v16  ;;  %v1386_v54 = vpop.f32.mrf.mxu3  ;;  %v1914_v10 = vpop.f32.mrf.mxu1  ;;  %v2493_v16 = vrot.slane %v2491_v21, 3 }
 0x210   : > { %v5069_v55 = vadd.f32 %v1914_v10, %v4607_v59  ;;  %v2488_v59 = vshrl.u32 %v5073_v45, 16  ;;  %v3111_v10 = vpop.permute.xlu0 %3110 }
 0x211   : > { %v1424_v1 = vadd.f32 %v1386_v54, %v1063_v38  ;;  %v5097_v54 = vld [vmem:[%s5576_s3] ss:$0 sm:$0xff] }
 0x212   : > { %v2870_v23 = vpop.f32.mrf.mxu0  ;;  %3752 = vmatmul.msk.bf16.gmra.mxu1 %vm532_vm2, %v1823_v35  ;;  %v2490_v36 = vrot.slane %v2488_v59, 2  ;;  %v5100_v35 = vld [vmem:[%s4187_s26 + $0x68] sm:$0xff]  ;;  %v2786_v59 = vrot.slane %v5073_v45, 3 }
 0x213   : > { %3837 = vmatmul.msk.bf16.gmra.mxu2 %vm532_vm2, %v2180_v9  ;;  %v5081_v14 = vadd.f32 %v1755_v46, %v1424_v1  ;;  %v2181_v9 = vrot.slane %v5073_v45, 2 }
 0x214   : > { %3856 = vmatmul.msk.bf16.gmra.mxu3 %vm532_vm2, %v2486_v62  ;;  %v5107_v1 = vor.u32 %v2493_v16, %v2490_v36 }
 0x215   : > { %3875 = vmatmul.msk.bf16.gmra.mxu0 %vm532_vm2, %v2785_v11  ;;  %v2182_v40 = vsel %vm1800_vm5, %v2179_v5, %v2181_v9 }
 0x216   : > { %v2265_v52 = vpop.f32.mrf.mxu2 }
 0x217   : > { %v2355_v19 = vadd.f32 %v2265_v52, %v4997_v3  ;;  %v2634_v27 = vpop.f32.mrf.mxu3  ;;  %v1916_v46 = vpop.f32.mrf.mxu1  ;;  %v1824_v3 = vrot.slane %v5100_v35, 2  ;;  %v3096_v35 = vld [vmem:[%s5574_s1 + $0xc0] sm:$0xff] }
 0x218   : > { %v5092_v49 = vadd.f32 %v1916_v46, %v4620_v22  ;;  %v3090_v22 = vld [vmem:[%s5574_s1 + $0x90] sm:$0xff] }
 0x219   : > { %v2724_v33 = vadd.f32 %v2634_v27, %v2355_v19  ;;  %3200 = vperm.xlu0 %4000, %v3090_v22   ;;  %v1825_v52 = vsel %vm1800_vm5, %v1822_v17, %v1824_v3  ;;  %v5119_v19 = vld [vmem:[%s4187_s26 + $0x68] sm:$0xff]  ;;  %v2787_v17 = vsel %vm2766_vm7, %v2784_v8, %v2786_v59  ;;  %v3116_v22 = vpop.permute.xlu0 %3115 }
 0x21a   : > { %v2872_v38 = vpop.f32.mrf.mxu0  ;;  %v2497_v5 = vshrl.u32 %v5119_v19, 16 }
 0x21b   : > { %v2960_v34 = vadd.f32 %v2870_v23, %v2724_v33 }
 0x21d   : > { %v3000_v58 = vadd.f32 %v5097_v54, %v2960_v34  ;;  %v2500_v34 = vshll.u32 %v5119_v19, 16 }
 0x21e   : > { %v2267_v62 = vpop.f32.mrf.mxu2 }
 0x21f   : > { %v2356_v23 = vadd.f32 %v2267_v62, %v5018_v56  ;;  %v2636_v11 = vpop.f32.mrf.mxu3  ;;  %v1919_v21 = vpop.f32.mrf.mxu1  ;;  %v2495_v56 = vsel %vm2397_vm6, %v2485_v31, %v5107_v1  ;;  %v3036_v36 = vmax.f32 %v3000_v58, 0.0 }
 0x220   : > { %v5122_v46 = vadd.f32 %v1919_v21, %v4627_v28  ;;  %v3091_v28 = vld [vmem:[%s5574_s1 + $0x98] sm:$0xff]  ;;  %v2499_v21 = vrot.slane %v2497_v5, 2  ;;  %v5149_v5 = vld [vmem:[%s4187_s26 + $0x70] sm:$0xff] }
 0x221   : > { %v2725_v27 = vadd.f32 %v2636_v11, %v2356_v23  ;;  %3205 = vperm.xlu1 %4001, %v3091_v28   ;;  %v3288_v62 = vmul.f32 %v3111_v10, %v3036_v36 }
 0x222   : > { %v2875_v16 = vpop.f32.mrf.mxu0  ;;  %3753 = vmatmul.msk.bf16.gmra.mxu1 %vm532_vm2, %v1825_v52 }
 0x223   : > { %v2961_v33 = vadd.f32 %v2872_v38, %v2725_v27  ;;  %3838 = vmatmul.msk.bf16.gmra.mxu2 %vm532_vm2, %v2182_v40  ;;  %v3325_v10 = vsel %vm3324_vm8, %v3288_v62, 0.0 }
 0x224   : > { %3857 = vmatmul.msk.bf16.gmra.mxu3 %vm532_vm2, %v2495_v56  ;;  %v2502_v56 = vrot.slane %v2500_v34, 3  ;;  %v3094_v34 = vld [vmem:[%s5574_s1 + $0xb0] sm:$0xff] }
 0x225   : > { %v3001_v31 = vadd.f32 %v5097_v54, %v2961_v33  ;;  %3876 = vmatmul.msk.bf16.gmra.mxu0 %vm532_vm2, %v2787_v17  ;;  %v3093_v33 = vld [vmem:[%s5574_s1 + $0xa8] sm:$0xff] }
 0x226   : > { %v2270_v38 = vpop.f32.mrf.mxu2  ;;  %3215 = vperm.xlu0 %4000, %v3093_v33   ;;  %v5160_v62 = vor.u32 %v2502_v56, %v2499_v21  ;;  %v5175_v56 = vld [vmem:[%s4187_s26 + $0x70] sm:$0xff] }
 0x227   : > { %v2357_v8 = vadd.f32 %v2270_v38, %v5033_v13  ;;  %v2639_v23 = vpop.f32.mrf.mxu3  ;;  %v3037_v11 = vmax.f32 %v3001_v31, 0.0  ;;  %v1921_v58 = vpop.f32.mrf.mxu1  ;;  %v1826_v38 = vrot.slane %v5149_v5, 2  ;;  %v3102_v5 = vld [vmem:[%s5574_s1 + $0xf0] sm:$0xff] }
 0x228   : > { %v5141_v27 = vadd.f32 %v1921_v58, %v4640_v37  ;;  %v3121_v31 = vpop.permute.xlu1 %3120  ;;  %v2183_v37 = vrot.slane %v5119_v19, 2 }
 0x229   : > { %v2726_v52 = vadd.f32 %v2639_v23, %v2357_v8  ;;  %v3289_v40 = vmul.f32 %v3116_v22, %v3037_v11  ;;  %3220 = vperm.xlu1 %4001, %v3094_v34   ;;  %v1827_v33 = vsel %vm1800_vm5, %v1824_v3, %v1826_v38 }
 0x22a   : > { %v2877_v17 = vpop.f32.mrf.mxu0  ;;  %v2184_v21 = vsel %vm1800_vm5, %v2181_v9, %v2183_v37 }
 0x22b   : > { %v2962_v36 = vadd.f32 %v2875_v16, %v2726_v52  ;;  %v3326_v13 = vsel %vm3324_vm8, %v3289_v40, 0.0  ;;  %v3089_v16 = vld [vmem:[%s5574_s1 + $0x88] sm:$0xff]  ;;  %v2788_v52 = vrot.slane %v5119_v19, 3 }
 0x22c   : > { %v3327_v28 = vadd.f32 %v3326_v13, %v3325_v10  ;;  %3195 = vperm.xlu2 %4002, %v3089_v16   ;;  %v2504_v13 = vsel %vm2397_vm6, %v5107_v1, %v5160_v62  ;;  %v2506_v1 = vshrl.u32 %v5175_v56, 16 }
 0x22d   : > { %v3002_v22 = vadd.f32 %v5097_v54, %v2962_v36 }
 0x22e   : > { %v2272_v8 = vpop.f32.mrf.mxu2  ;;  %3230 = vperm.xlu0 %4000, %v3096_v35  }
 0x22f   : > { %v2358_v23 = vadd.f32 %v2272_v8, %v5054_v15  ;;  %v2641_v11 = vpop.f32.mrf.mxu3  ;;  %v3038_v58 = vmax.f32 %v3002_v22, 0.0  ;;  %v1924_v40 = vpop.f32.mrf.mxu1  ;;  %v2509_v22 = vshll.u32 %v5175_v56, 16 }
 0x230   : > { %v5178_v36 = vadd.f32 %v1924_v40, %v4647_v44  ;;  %v2789_v44 = vsel %vm2766_vm7, %v2786_v59, %v2788_v52  ;;  %v3126_v8 = vpop.permute.xlu1 %3125 }
 0x231   : > { %v2727_v15 = vadd.f32 %v2641_v11, %v2358_v23  ;;  %v3290_v10 = vmul.f32 %v3121_v31, %v3038_v58  ;;  %v2508_v58 = vrot.slane %v2506_v1, 2 }
 0x232   : > { %v2880_v16 = vpop.f32.mrf.mxu0  ;;  %3754 = vmatmul.msk.bf16.gmra.mxu1 %vm532_vm2, %v1827_v33 }
 0x233   : > { %v2963_v3 = vadd.f32 %v2877_v17, %v2727_v15  ;;  %v3328_v34 = vsel %vm3324_vm8, %v3290_v10, 0.0  ;;  %3839 = vmatmul.msk.bf16.gmra.mxu2 %vm532_vm2, %v2184_v21  ;;  %v3097_v17 = vld [vmem:[%s5574_s1 + $0xc8] sm:$0xff]  ;;  %v2511_v15 = vrot.slane %v2509_v22, 3  ;;  %v3099_v10 = vld [vmem:[%s5574_s1 + $0xd8] sm:$0xff] }
 0x234   : > { %v3329_v9 = vadd.f32 %v3328_v34, %v3327_v28  ;;  %3858 = vmatmul.msk.bf16.gmra.mxu3 %vm532_vm2, %v2504_v13  ;;  %3235 = vperm.xlu1 %4001, %v3097_v17   ;;  %v2185_v17 = vrot.slane %v5175_v56, 2 }
 0x235   : > { %v3003_v31 = vadd.f32 %v5097_v54, %v2963_v3  ;;  %3877 = vmatmul.msk.bf16.gmra.mxu0 %vm532_vm2, %v2789_v44  ;;  %v5211_v44 = vld [vmem:[%s4187_s26 + $0x78] sm:$0xff] }
 0x236   : > { %v2275_v45 = vpop.f32.mrf.mxu2  ;;  %v1828_v1 = vrot.slane %v5211_v44, 2  ;;  %3245 = vperm.xlu0 %4000, %v3099_v10  }
 0x237   : > { %v2359_v59 = vadd.f32 %v2275_v45, %v5069_v55  ;;  %v2644_v28 = vpop.f32.mrf.mxu3  ;;  %v3039_v23 = vmax.f32 %v3003_v31, 0.0  ;;  %v1926_v11 = vpop.f32.mrf.mxu1 }
 0x238   : > { %v5204_v21 = vadd.f32 %v1926_v11, %v4660_v51  ;;  %v3131_v55 = vpop.permute.xlu2 %3130  ;;  %v3100_v51 = vld [vmem:[%s5574_s1 + $0xe0] sm:$0xff]  ;;  %v1829_v11 = vsel %vm1800_vm5, %v1826_v38, %v1828_v1 }
 0x239   : > { %v2728_v40 = vadd.f32 %v2644_v28, %v2359_v59  ;;  %v3291_v33 = vmul.f32 %v3126_v8, %v3039_v23  ;;  %v2790_v28 = vrot.slane %v5175_v56, 3  ;;  %v3101_v56 = vld [vmem:[%s5574_s1 + $0xe8] sm:$0xff] }
 0x23a   : > { %v2882_v3 = vpop.f32.mrf.mxu0 }
 0x23b   : > { %v2964_v13 = vadd.f32 %v2880_v16, %v2728_v40  ;;  %v3330_v35 = vsel %vm3324_vm8, %v3291_v33, 0.0  ;;  %v3092_v16 = vld [vmem:[%s5574_s1 + $0xa0] sm:$0xff]  ;;  %v5237_v40 = vld [vmem:[%s4187_s26 + $0x78] sm:$0xff] }
 0x23c   : > { %v3331_v34 = vadd.f32 %v3330_v35, %v3329_v9  ;;  %v5222_v9 = vor.u32 %v2511_v15, %v2508_v58  ;;  %3250 = vperm.xlu1 %4001, %v3100_v51   ;;  %3210 = vperm.xlu2 %4002, %v3092_v16   ;;  %v2186_v58 = vsel %vm1800_vm5, %v2183_v37, %v2185_v17  ;;  %v2518_v51 = vshll.u32 %v5237_v40, 16 }
 0x23d   : > { %v3004_v31 = vadd.f32 %v5097_v54, %v2964_v13 }
 0x23e   : > { %v2277_v22 = vpop.f32.mrf.mxu2  ;;  %v2513_v10 = vsel %vm2397_vm6, %v5160_v62, %v5222_v9  ;;  %v2515_v62 = vshrl.u32 %v5237_v40, 16  ;;  %3260 = vperm.xlu0 %4000, %v3102_v5  }
 0x23f   : > { %v2360_v45 = vadd.f32 %v2277_v22, %v5092_v49  ;;  %v2646_v8 = vpop.f32.mrf.mxu3  ;;  %v3040_v59 = vmax.f32 %v3004_v31, 0.0  ;;  %v1929_v23 = vpop.f32.mrf.mxu1 }
 0x240   : > { %v5240_v15 = vadd.f32 %v1929_v23, %v4668_v18  ;;  %v2791_v18 = vsel %vm2766_vm7, %v2788_v52, %v2790_v28  ;;  %v3136_v16 = vpop.permute.xlu2 %3135  ;;  %v3095_v52 = vld [vmem:[%s5574_s1 + $0xb8] sm:$0xff] }
 0x241   : > { %v2729_v49 = vadd.f32 %v2646_v8, %v2360_v45  ;;  %v3292_v33 = vmul.f32 %v3131_v55, %v3040_v59  ;;  %v2517_v8 = vrot.slane %v2515_v62, 2  ;;  %v3098_v62 = vld [vmem:[%s5574_s1 + $0xd0] sm:$0xff] }
 0x242   : > { %v2885_v35 = vpop.f32.mrf.mxu0  ;;  %3755 = vmatmul.msk.bf16.gmra.mxu1 %vm532_vm2, %v1829_v11 }
 0x243   : > { %v2965_v38 = vadd.f32 %v2882_v3, %v2729_v49  ;;  %v3332_v13 = vsel %vm3324_vm8, %v3292_v33, 0.0  ;;  %3840 = vmatmul.msk.bf16.gmra.mxu2 %vm532_vm2, %v2186_v58  ;;  %v3103_v3 = vld [vmem:[%s5574_s1 + $0xf8] sm:$0xff]  ;;  %v2520_v58 = vrot.slane %v2518_v51, 3  ;;  %v3105_v49 = vld [vmem:[%s5574_s1 + $0x108] sm:$0xff] }
 0x244   : > { %v3333_v37 = vadd.f32 %v3332_v13, %v3331_v34  ;;  %3859 = vmatmul.msk.bf16.gmra.mxu3 %vm532_vm2, %v2513_v10  ;;  %3265 = vperm.xlu1 %4001, %v3103_v3  }
 0x245   : > { %v3005_v55 = vadd.f32 %v5097_v54, %v2965_v38  ;;  %3878 = vmatmul.msk.bf16.gmra.mxu0 %vm532_vm2, %v2791_v18  ;;  %3225 = vperm.xlu2 %4002, %v3095_v52   ;;  %v5276_v38 = vld [vmem:[%s4187_s26 + $0x80] sm:$0xff]  ;;  %v2187_v18 = vrot.slane %v5237_v40, 2  ;;  %v5287_v3 = vor.u32 %v2520_v58, %v2517_v8  ;;  %v2792_v52 = vrot.slane %v5237_v40, 3  ;;  %v3107_v40 = vld [vmem:[%s5574_s1 + $0x118] sm:$0xff] }
 0x246   : > { %v2280_v19 = vpop.f32.mrf.mxu2  ;;  %v1830_v13 = vrot.slane %v5276_v38, 2  ;;  %3275 = vperm.xlu0 %4000, %v3105_v49  }
 0x247   : > { %v2361_v34 = vadd.f32 %v2280_v19, %v5122_v46  ;;  %v2649_v31 = vpop.f32.mrf.mxu3  ;;  %v3041_v22 = vmax.f32 %v3005_v55, 0.0  ;;  %v1931_v45 = vpop.f32.mrf.mxu1 }
 0x248   : > { %v5269_v11 = vadd.f32 %v1931_v45, %v4684_v7  ;;  %v3106_v7 = vld [vmem:[%s5574_s1 + $0x110] sm:$0xff]  ;;  %v3141_v55 = vpop.permute.xlu0 %3140 }
 0x249   : > { %v2730_v59 = vadd.f32 %v2649_v31, %v2361_v34  ;;  %v3293_v23 = vmul.f32 %v3136_v16, %v3041_v22  ;;  %v1831_v31 = vsel %vm1800_vm5, %v1828_v1, %v1830_v13  ;;  %v2188_v22 = vsel %vm1800_vm5, %v2185_v17, %v2187_v18 }
 0x24a   : > { %v2887_v5 = vpop.f32.mrf.mxu0 }
 0x24b   : > { %v2966_v33 = vadd.f32 %v2885_v35, %v2730_v59  ;;  %v3334_v10 = vsel %vm3324_vm8, %v3293_v23, 0.0  ;;  %v2522_v59 = vsel %vm2397_vm6, %v5222_v9, %v5287_v3  ;;  %v5308_v23 = vld [vmem:[%s4187_s26 + $0x80] sm:$0xff] }
 0x24c   : > { %v3335_v46 = vadd.f32 %v3334_v10, %v3333_v37  ;;  %3280 = vperm.xlu1 %4001, %v3106_v7   ;;  %v2524_v49 = vshrl.u32 %v5308_v23, 16 }
 0x24d   : > { %v3006_v35 = vadd.f32 %v5097_v54, %v2966_v33  ;;  %3240 = vperm.xlu2 %4002, %v3098_v62   ;;  %v2527_v33 = vshll.u32 %v5308_v23, 16 }
 0x24e   : > { %v2282_v37 = vpop.f32.mrf.mxu2 }
 0x24f   : > { %v2362_v51 = vadd.f32 %v2282_v37, %v5141_v27  ;;  %v2651_v19 = vpop.f32.mrf.mxu3  ;;  %v3042_v16 = vmax.f32 %v3006_v35, 0.0  ;;  %v1934_v34 = vpop.f32.mrf.mxu1 }
 0x250   : > { %v5302_v8 = vadd.f32 %v1934_v34, %v4694_v41  ;;  %v2793_v41 = vsel %vm2766_vm7, %v2790_v28, %v2792_v52 }
 0x251   : > { %v2731_v45 = vadd.f32 %v2651_v19, %v2362_v51  ;;  %v3294_v27 = vmul.f32 %v3141_v55, %v3042_v16  ;;  %v2526_v55 = vrot.slane %v2524_v49, 2  ;;  %v2529_v51 = vrot.slane %v2527_v33, 3 }
 0x252   : > { %v2890_v58 = vpop.f32.mrf.mxu0  ;;  %3756 = vmatmul.msk.bf16.gmra.mxu1 %vm532_vm2, %v1831_v31  ;;  %v2794_v49 = vrot.slane %v5308_v23, 3 }
 0x253   : > { %v2967_v44 = vadd.f32 %v2887_v5, %v2731_v45  ;;  %v3336_v1 = vsel %vm3324_vm8, %v3294_v27, 0.0  ;;  %3841 = vmatmul.msk.bf16.gmra.mxu2 %vm532_vm2, %v2188_v22  ;;  %v3146_v5 = vpop.permute.xlu1 %3145  ;;  %v5331_v22 = vld [vmem:[%s4187_s26 + $0x88] sm:$0xff]  ;;  %v3104_v27 = vld [vmem:[%s5574_s1 + $0x100] sm:$0xff] }
 0x254   : > { %v3337_v17 = vadd.f32 %v3336_v1, %v3335_v46  ;;  %3860 = vmatmul.msk.bf16.gmra.mxu3 %vm532_vm2, %v2522_v59  ;;  %v1832_v45 = vrot.slane %v5331_v22, 2 }
 0x255   : > { %v3007_v9 = vadd.f32 %v5097_v54, %v2967_v44  ;;  %3879 = vmatmul.msk.bf16.gmra.mxu0 %vm532_vm2, %v2793_v41  ;;  %3255 = vperm.xlu2 %4002, %v3101_v56   ;;  %v5339_v44 = vor.u32 %v2529_v51, %v2526_v55  ;;  %v5350_v56 = vld [vmem:[%s4187_s26 + $0x88] sm:$0xff] }
 0x256   : > { %v2285_v10 = vpop.f32.mrf.mxu2  ;;  %v2536_v55 = vshll.u32 %v5350_v56, 16 }
 0x257   : > { %v2363_v28 = vadd.f32 %v2285_v10, %v5178_v36  ;;  %v2654_v46 = vpop.f32.mrf.mxu3  ;;  %v3043_v7 = vmax.f32 %v3007_v9, 0.0  ;;  %v5327_v62 = vpop.f32.mrf.mxu1  ;;  %v2189_v36 = vrot.slane %v5308_v23, 2  ;;  %v1833_v10 = vsel %vm1800_vm5, %v1830_v13, %v1832_v45 }
 0x258   : > { %v2795_v13 = vsel %vm2766_vm7, %v2792_v52, %v2794_v49 }
 0x259   : > { %v2732_v35 = vadd.f32 %v2654_v46, %v2363_v28  ;;  %v3295_v37 = vmul.f32 %v3146_v5, %v3043_v7  ;;  %v2190_v5 = vsel %vm1800_vm5, %v2187_v18, %v2189_v36  ;;  %v2531_v7 = vsel %vm2397_vm6, %v5287_v3, %v5339_v44 }
 0x25a   : > { %v2892_v34 = vpop.f32.mrf.mxu0  ;;  %v2533_v18 = vshrl.u32 %v5350_v56, 16 }
 0x25b   : > { %v2968_v19 = vadd.f32 %v2890_v58, %v2732_v35  ;;  %v3338_v16 = vsel %vm3324_vm8, %v3295_v37, 0.0  ;;  %v3151_v58 = vpop.permute.xlu2 %3150 }
 0x25c   : > { %v3339_v31 = vadd.f32 %v3338_v16, %v3337_v17  ;;  %v2535_v22 = vrot.slane %v2533_v18, 2 }
 0x25d   : > { %v3008_v59 = vadd.f32 %v5097_v54, %v2968_v19  ;;  %3270 = vperm.xlu2 %4002, %v3104_v27   ;;  %v3156_v19 = vpop.permute.xlu0 %3155 }
 0x25e   : > { %v2287_v1 = vpop.f32.mrf.mxu2 }
 0x25f   : > { %v2364_v41 = vadd.f32 %v2287_v1, %v5204_v21  ;;  %v2656_v17 = vpop.f32.mrf.mxu3  ;;  %v3044_v9 = vmax.f32 %v3008_v59, 0.0  ;;  %v1939_v33 = vpop.f32.mrf.mxu1 }
 0x260   : > { %v5353_v21 = vadd.f32 %v1939_v33, %v4724_v20 }
 0x261   : > { %v2733_v28 = vadd.f32 %v2656_v17, %v2364_v41  ;;  %v3296_v46 = vmul.f32 %v3151_v58, %v3044_v9  ;;  %v2538_v58 = vrot.slane %v2536_v55, 3  ;;  %v5387_v55 = vld [vmem:[%s4187_s26 + $0x90] sm:$0xff] }
 0x262   : > { %v2895_v37 = vpop.f32.mrf.mxu0  ;;  %3757 = vmatmul.msk.bf16.gmra.mxu1 %vm532_vm2, %v1833_v10  ;;  %v4016_v10 = vld [vmem:[%s4187_s26 + $0x90] sm:$0xff] }
 0x263   : > { %v2969_v35 = vadd.f32 %v2892_v34, %v2733_v28  ;;  %v3340_v38 = vsel %vm3324_vm8, %v3296_v46, 0.0  ;;  %3842 = vmatmul.msk.bf16.gmra.mxu2 %vm532_vm2, %v2190_v5  ;;  %v1834_v5 = vrot.slane %v4016_v10, 2  ;;  %v2539_v46 = vor.u32 %v2538_v58, %v2535_v22  ;;  %v3166_v22 = vpop.permute.xlu2 %3165 }
 0x264   : > { %v3341_v20 = vadd.f32 %v3340_v38, %v3339_v31  ;;  %3861 = vmatmul.msk.bf16.gmra.mxu3 %vm532_vm2, %v2531_v7 }
 0x265   : > { %v3009_v3 = vadd.f32 %v5097_v54, %v2969_v35  ;;  %3880 = vmatmul.msk.bf16.gmra.mxu0 %vm532_vm2, %v2795_v13  ;;  %3285 = vperm.xlu2 %4002, %v3107_v40   ;;  %v3161_v35 = vpop.permute.xlu1 %3160 }
 0x266   : > { %v2290_v51 = vpop.f32.mrf.mxu2 }
 0x267   : > { %v2365_v52 = vadd.f32 %v2290_v51, %v5240_v15  ;;  %v2659_v16 = vpop.f32.mrf.mxu3  ;;  %v3045_v34 = vmax.f32 %v3009_v3, 0.0  ;;  %v1941_v31 = vpop.f32.mrf.mxu1  ;;  %v2191_v15 = vrot.slane %v5350_v56, 2  ;;  %v1835_v3 = vsel %vm1800_vm5, %v1832_v45, %v1834_v5 }
 0x268   : > { %v5376_v1 = vadd.f32 %v1941_v31, %v4743_v6 }
 0x269   : > { %v2734_v27 = vadd.f32 %v2659_v16, %v2365_v52  ;;  %v3297_v59 = vmul.f32 %v3156_v19, %v3045_v34  ;;  %v2540_v52 = vsel %vm2397_vm6, %v5339_v44, %v2539_v46  ;;  %v2545_v44 = vshll.u32 %v5387_v55, 16 }
 0x26a   : > { %v2897_v9 = vpop.f32.mrf.mxu0 }
 0x26b   : > { %v2970_v41 = vadd.f32 %v2895_v37, %v2734_v27  ;;  %v3342_v17 = vsel %vm3324_vm8, %v3297_v59, 0.0  ;;  %v2796_v37 = vrot.slane %v5350_v56, 3 }
 0x26c   : > { %v3343_v33 = vadd.f32 %v3342_v17, %v3341_v20  ;;  %v2192_v20 = vsel %vm1800_vm5, %v2189_v36, %v2191_v15 }
 0x26d   : > { %v3010_v28 = vadd.f32 %v5097_v54, %v2970_v41  ;;  %v2797_v45 = vsel %vm2766_vm7, %v2794_v49, %v2796_v37 }
 0x26e   : > { %v2292_v7 = vpop.f32.mrf.mxu2 }
 0x26f   : > { %v2366_v38 = vadd.f32 %v2292_v7, %v5269_v11  ;;  %v2661_v6 = vpop.f32.mrf.mxu3  ;;  %v3046_v13 = vmax.f32 %v3010_v28, 0.0  ;;  %v1944_v18 = vpop.f32.mrf.mxu1 }
 0x270   : > { %v5390_v40 = vadd.f32 %v1944_v18, %v4755_v30  ;;  %v2542_v30 = vshrl.u32 %v5387_v55, 16 }
 0x271   : > { %v2735_v51 = vadd.f32 %v2661_v6, %v2366_v38  ;;  %v3298_v19 = vmul.f32 %v3161_v35, %v3046_v13  ;;  %v1836_v38 = vrot.slane %v4741_v57, 2  ;;  %v2007_v6 = vadd.f32 %v5327_v62, %v4712_v50 }
 0x272   : > { %v2900_v34 = vpop.f32.mrf.mxu0  ;;  %3758 = vmatmul.msk.bf16.gmra.mxu1 %vm532_vm2, %v1835_v3  ;;  %v2544_v41 = vrot.slane %v2542_v30, 2 }
 0x273   : > { %v2971_v11 = vadd.f32 %v2897_v9, %v2735_v51  ;;  %v3344_v16 = vsel %vm3324_vm8, %v3298_v19, 0.0  ;;  %3843 = vmatmul.msk.bf16.gmra.mxu2 %vm532_vm2, %v2192_v20 }
 0x274   : > { %v3345_v36 = vadd.f32 %v3344_v16, %v3343_v33  ;;  %3862 = vmatmul.msk.bf16.gmra.mxu3 %vm532_vm2, %v2540_v52  ;;  %v2547_v33 = vrot.slane %v2545_v44, 3  ;;  %v2798_v52 = vrot.slane %v5387_v55, 3  ;;  %v1837_v16 = vsel %vm1800_vm5, %v1834_v5, %v1836_v38 }
 0x275   : > { %v3011_v56 = vadd.f32 %v5097_v54, %v2971_v11  ;;  %3881 = vmatmul.msk.bf16.gmra.mxu0 %vm532_vm2, %v2797_v45 }
 0x276   : > { %v2295_v31 = vpop.f32.mrf.mxu2  ;;  %v2548_v18 = vor.u32 %v2547_v33, %v2544_v41  ;;  %v2799_v5 = vsel %vm2766_vm7, %v2796_v37, %v2798_v52 }
 0x277   : > { %v2367_v27 = vadd.f32 %v2295_v31, %v5302_v8  ;;  %v2664_v59 = vpop.f32.mrf.mxu3  ;;  %v3047_v58 = vmax.f32 %v3011_v56, 0.0  ;;  %v1946_v23 = vpop.f32.mrf.mxu1  ;;  %v2193_v8 = vrot.slane %v5387_v55, 2 }
 0x278   : > { %v5407_v9 = vadd.f32 %v1946_v23, %v4772_v63  ;;  %v3171_v63 = vpop.permute.xlu0 %3170  ;;  %v2549_v62 = vsel %vm2397_vm6, %v2539_v46, %v2548_v18 }
 0x279   : > { %v2736_v49 = vadd.f32 %v2664_v59, %v2367_v27  ;;  %v3299_v17 = vmul.f32 %v3166_v22, %v3047_v58  ;;  %v2194_v57 = vsel %vm1800_vm5, %v2191_v15, %v2193_v8  ;;  %v3176_v22 = vpop.permute.xlu1 %3175 }
 0x27a   : > { %v2902_v7 = vpop.f32.mrf.mxu0 }
 0x27b   : > { %v2972_v10 = vadd.f32 %v2900_v34, %v2736_v49  ;;  %v3346_v28 = vsel %vm3324_vm8, %v3299_v17, 0.0  ;;  %v5419_v34 = vld [vmem:[%s4187_s26 + $0x98] sm:$0xff] }
 0x27c   : > { %v3347_v35 = vadd.f32 %v3346_v28, %v3345_v36  ;;  %v2551_v55 = vshrl.u32 %v5419_v34, 16  ;;  %v2554_v46 = vshll.u32 %v5419_v34, 16 }
 0x27d   : > { %v3012_v13 = vadd.f32 %v5097_v54, %v2972_v10  ;;  %v2391_v10 = vld [vmem:[%s4187_s26 + $0xa0] sm:$0x7] }
 0x27e   : > { %v2297_v3 = vpop.f32.mrf.mxu2  ;;  %v2553_v37 = vrot.slane %v2551_v55, 2  ;;  %v2556_v33 = vrot.slane %v2554_v46, 3 }
 0x27f   : > { %v2368_v20 = vadd.f32 %v2297_v3, %v2007_v6  ;;  %v2666_v51 = vpop.f32.mrf.mxu3  ;;  %v3048_v19 = vmax.f32 %v3012_v13, 0.0  ;;  %v1949_v11 = vpop.f32.mrf.mxu1  ;;  %v2195_v6 = vrot.slane %v5419_v34, 2  ;;  %v2395_v13 = vunpack.c.l.b16 %v2391_v10 }
 0x280   : > { %v5422_v50 = vadd.f32 %v1949_v11, %v4786_v61  ;;  %v2557_v3 = vor.u32 %v2556_v33, %v2553_v37  ;;  %v2800_v11 = vrot.slane %v5419_v34, 3 }
 0x281   : > { %v2737_v45 = vadd.f32 %v2666_v51, %v2368_v20  ;;  %v3300_v36 = vmul.f32 %v3171_v63, %v3048_v19  ;;  %v3181_v20 = vpop.permute.xlu2 %3180 }
 0x282   : > { %v2905_v44 = vpop.f32.mrf.mxu0  ;;  %3759 = vmatmul.msk.bf16.gmra.mxu1 %vm532_vm2, %v1837_v16  ;;  %v2801_v34 = vsel %vm2766_vm7, %v2798_v52, %v2800_v11 }
 0x283   : > { %v2973_v30 = vadd.f32 %v2902_v7, %v2737_v45  ;;  %v3348_v56 = vsel %vm3324_vm8, %v3300_v36, 0.0  ;;  %3844 = vmatmul.msk.bf16.gmra.mxu2 %vm532_vm2, %v2194_v57  ;;  %v2196_v57 = vsel %vm1800_vm5, %v2193_v8, %v2195_v6  ;;  %v2396_v45 = vpack.c.b16 %v2395_v13, %v2395_v13 }
 0x284   : > { %v3349_v15 = vadd.f32 %v3348_v56, %v3347_v35  ;;  %3863 = vmatmul.msk.bf16.gmra.mxu3 %vm532_vm2, %v2549_v62  ;;  %v2558_v56 = vsel %vm2397_vm6, %v2548_v18, %v2557_v3 }
 0x285   : > { %v3013_v61 = vadd.f32 %v5097_v54, %v2973_v30  ;;  %3882 = vmatmul.msk.bf16.gmra.mxu0 %vm532_vm2, %v2799_v5 }
 0x286   : > { %v2300_v31 = vpop.f32.mrf.mxu2 }
 0x287   : > { %v2369_v27 = vadd.f32 %v2300_v31, %v5353_v21  ;;  %v2669_v59 = vpop.f32.mrf.mxu3  ;;  %v3049_v58 = vmax.f32 %v3013_v61, 0.0  ;;  %v1951_v23 = vpop.f32.mrf.mxu1  ;;  %v2560_v61 = vshrl.u32 %v2396_v45, 16 }
 0x288   : > { %v5436_v17 = vadd.f32 %v1951_v23, %v4804_v0  ;;  %v3186_v31 = vpop.permute.xlu0 %3185 }
 0x289   : > { %v2738_v41 = vadd.f32 %v2669_v59, %v2369_v27  ;;  %v3301_v49 = vmul.f32 %v3176_v22, %v3049_v58  ;;  %v2562_v37 = vrot.slane %v2560_v61, 2 }
 0x28a   : > { %v2907_v35 = vpop.f32.mrf.mxu0 }
 0x28b   : > { %v2974_v28 = vadd.f32 %v2905_v44, %v2738_v41  ;;  %v3350_v7 = vsel %vm3324_vm8, %v3301_v49, 0.0  ;;  %v2066_v44 = vld [vmem:[%s4187_s26 + $0xa0] sm:$0x3]  ;;  %s4034_s26 = scalar_lea.hbm %s4033_s29, 1 }
 0x28c   : > { %v3351_v38 = vadd.f32 %v3350_v7, %v3349_v15  ;;  %v2142_v8 = vunpack.c.l.b16 %v2066_v44  ;;  %p4035_p11 = scmp.ne.s32.totalorder %s4033_s29, %s4034_s26  ;;  %p4040_p1 = scmp.lt.s32.totalorder %s4038_s10, %s4034_s26 }
 0x28d   : > { %v3014_v21 = vadd.f32 %v5097_v54, %v2974_v28 }
 0x28e   : > { %v2302_v63 = vpop.f32.mrf.mxu2  ;;  %v2161_v23 = vpack.c.b16 %v2142_v8, %v2142_v8  ;;  %p4036_p12 = pnand %p4035_p11, %p4156_p5  ;;  %p4041_p2 = por %p4040_p1, %p4039_p0 }
 0x28f   : > { %v2370_v51 = vadd.f32 %v2302_v63, %v5376_v1  ;;  %v2671_v0 = vpop.f32.mrf.mxu3  ;;  %v3050_v19 = vmax.f32 %v3014_v21, 0.0  ;;  %v1954_v16 = vpop.f32.mrf.mxu1 }
 0x290   : > { %v5446_v30 = vadd.f32 %v1954_v16, %v4820_v24  ;;  %v2563_v24 = vshll.u32 %v2396_v45, 16  ;;  %v3191_v63 = vpop.permute.xlu1 %3190  ;;  %p4037_p13 = pneg %p4036_p12 }
 0x291   : > { %v2739_v36 = vadd.f32 %v2671_v0, %v2370_v51  ;;  %v3302_v62 = vmul.f32 %v3181_v20, %v3050_v19  ;;  %v2802_v19 = vrot.slane %v2396_v45, 3 }
 0x292   : > { %v2910_v1 = vpop.f32.mrf.mxu0  ;;  %v2565_v33 = vrot.slane %v2563_v24, 3  ;;  %p4042_p3 = pnand %p4041_p2, %p4037_p13 }
 0x293   : > { %v2975_v5 = vadd.f32 %v2907_v35, %v2739_v36  ;;  %v3352_v15 = vsel %vm3324_vm8, %v3302_v62, 0.0  ;;  %3845 = vmatmul.msk.bf16.gmra.mxu2 %vm532_vm2, %v2196_v57 }
 0x294   : > { %v3353_v55 = vadd.f32 %v3352_v15, %v3351_v38  ;;  %3864 = vmatmul.msk.bf16.gmra.mxu3 %vm532_vm2, %v2558_v56  ;;  %v2197_v38 = vrot.slane %v2161_v23, 2 }
 0x295   : > { %v3015_v46 = vadd.f32 %v5097_v54, %v2975_v5  ;;  %3883 = vmatmul.msk.bf16.gmra.mxu0 %vm532_vm2, %v2801_v34 }
 0x296   : > { %v2305_v18 = vpop.f32.mrf.mxu2 }
 0x297   : > { %v2371_v22 = vadd.f32 %v2305_v18, %v5390_v40  ;;  %v2674_v27 = vpop.f32.mrf.mxu3  ;;  %v3051_v59 = vmax.f32 %v3015_v46, 0.0  ;;  %v1956_v58 = vpop.f32.mrf.mxu1  ;;  %v2566_v40 = vor.u32 %v2565_v33, %v2562_v37 }
 0x298   : > { %v5458_v49 = vadd.f32 %v1956_v58, %v4838_v12  ;;  %v2198_v12 = vsel %vm1800_vm5, %v2195_v6, %v2197_v38 }
 0x299   : > { %v2740_v52 = vadd.f32 %v2674_v27, %v2371_v22  ;;  %v3303_v41 = vmul.f32 %v3186_v31, %v3051_v59  ;;  %v2567_v56 = vsel %vm2397_vm6, %v2557_v3, %v2566_v40  ;;  %v3947_v27 = vld [vmem:[%s5577_s4] sm:$0xff] }
 0x29a   : > { %v2912_v7 = vpop.f32.mrf.mxu0  ;;  %3431 = vmatpush.bf16.msrb.mxu1 %v3947_v27 }
 0x29b   : > { %v2976_v10 = vadd.f32 %v2910_v1, %v2740_v52  ;;  %v3354_v28 = vsel %vm3324_vm8, %v3303_v41, 0.0 }
 0x29c   : > { %v3355_v35 = vadd.f32 %v3354_v28, %v3353_v55 }
 0x29d   : > { %v3016_v13 = vadd.f32 %v5097_v54, %v2976_v10 }
 0x29e   : > { %v2307_v21 = vpop.f32.mrf.mxu2 }
 0x29f   : > { %v2372_v20 = vadd.f32 %v2307_v21, %v5407_v9  ;;  %v2676_v51 = vpop.f32.mrf.mxu3  ;;  %v3052_v0 = vmax.f32 %v3016_v13, 0.0  ;;  %v1959_v16 = vpop.f32.mrf.mxu1  ;;  %v2803_v9 = vsel %vm2766_vm7, %v2800_v11, %v2802_v19 }
 0x2a0   : > { %v5465_v62 = vadd.f32 %v1959_v16, %v4851_v29  ;;  %v3196_v29 = vpop.permute.xlu2 %3195 }
 0x2a1   : > { %v2741_v57 = vadd.f32 %v2676_v51, %v2372_v20  ;;  %v3304_v36 = vmul.f32 %v3191_v63, %v3052_v0 }
 0x2a2   : > { %v2915_v15 = vpop.f32.mrf.mxu0 }
 0x2a3   : > { %v2977_v44 = vadd.f32 %v2912_v7, %v2741_v57  ;;  %v3356_v5 = vsel %vm3324_vm8, %v3304_v36, 0.0  ;;  %3846 = vmatmul.msk.bf16.gmra.mxu2 %vm532_vm2, %v2198_v12 }
 0x2a4   : > { %v3357_v1 = vadd.f32 %v3356_v5, %v3355_v35  ;;  %3865 = vmatmul.msk.bf16.gmra.mxu3 %vm532_vm2, %v2567_v56 }
 0x2a5   : > { %v3017_v6 = vadd.f32 %v5097_v54, %v2977_v44  ;;  %3884 = vmatmul.msk.bf16.gmra.mxu0 %vm532_vm2, %v2803_v9 }
 0x2a6   : > { %v2310_v45 = vpop.f32.mrf.mxu2 }
 0x2a7   : > { %v2373_v34 = vadd.f32 %v2310_v45, %v5422_v50  ;;  %v2679_v3 = vpop.f32.mrf.mxu3  ;;  %v3053_v55 = vmax.f32 %v3017_v6, 0.0  ;;  %v1961_v8 = vpop.f32.mrf.mxu1 }
 0x2a8   : > { %v2017_v24 = vadd.f32 %v1961_v8, %v4869_v25  ;;  %v3201_v50 = vpop.permute.xlu0 %3200 }
 0x2a9   : > { %v2742_v61 = vadd.f32 %v2679_v3, %v2373_v34  ;;  %v3305_v46 = vmul.f32 %v3196_v29, %v3053_v55 }
 0x2aa   : > { %v2917_v31 = vpop.f32.mrf.mxu0 }
 0x2ab   : > { %v2978_v18 = vadd.f32 %v2915_v15, %v2742_v61  ;;  %v3358_v11 = vsel %vm3324_vm8, %v3305_v46, 0.0  ;;  %v3211_v15 = vpop.permute.xlu2 %3210 }
 0x2ac   : > { %v3359_v22 = vadd.f32 %v3358_v11, %v3357_v1 }
 0x2ad   : > { %v3018_v59 = vadd.f32 %v5097_v54, %v2978_v18 }
 0x2ae   : > { %v2312_v58 = vpop.f32.mrf.mxu2 }
 0x2af   : > { %v2374_v23 = vadd.f32 %v2312_v58, %v5436_v17  ;;  %v2681_v37 = vpop.f32.mrf.mxu3  ;;  %v3054_v52 = vmax.f32 %v3018_v59, 0.0  ;;  %v1964_v41 = vpop.f32.mrf.mxu1 }
 0x2b0   : > { %v2018_v10 = vadd.f32 %v1964_v41, %v4882_v26  ;;  %v3206_v17 = vpop.permute.xlu1 %3205  ;;  %v3216_v18 = vpop.permute.xlu0 %3215 }
 0x2b1   : > { %v2743_v25 = vadd.f32 %v2681_v37, %v2374_v23  ;;  %v3306_v33 = vmul.f32 %v3201_v50, %v3054_v52 }
 0x2b2   : > { %v2920_v35 = vpop.f32.mrf.mxu0 }
 0x2b3   : > { %v2979_v28 = vadd.f32 %v2917_v31, %v2743_v25  ;;  %v3360_v7 = vsel %vm3324_vm8, %v3306_v33, 0.0 }
 0x2b4   : > { %v3361_v38 = vadd.f32 %v3360_v7, %v3359_v22 }
 0x2b5   : > { %v3019_v13 = vadd.f32 %v5097_v54, %v2979_v28 }
 0x2b6   : > { %v2315_v40 = vpop.f32.mrf.mxu2 }
 0x2b7   : > { %v3055_v21 = vmax.f32 %v3019_v13, 0.0  ;;  %v2375_v63 = vadd.f32 %v2315_v40, %v5446_v30  ;;  %v2684_v20 = vpop.f32.mrf.mxu3  ;;  %v1966_v3 = vpop.f32.mrf.mxu1 }
 0x2b8   : > { %v3221_v41 = vpop.permute.xlu1 %3220 }
 0x2b9   : > { %v3307_v51 = vmul.f32 %v3206_v17, %v3055_v21  ;;  %v2744_v0 = vadd.f32 %v2684_v20, %v2375_v63  ;;  %v3226_v17 = vpop.permute.xlu2 %3225 }
 0x2ba   : > { %v2922_v12 = vpop.f32.mrf.mxu0 }
 0x2bb   : > { %v3362_v19 = vsel %vm3324_vm8, %v3307_v51, 0.0  ;;  %v2980_v16 = vadd.f32 %v2920_v35, %v2744_v0 }
 0x2bc   : > { %v3363_v26 = vadd.f32 %v3362_v19, %v3361_v38 }
 0x2bd   : > { %v3020_v57 = vadd.f32 %v5097_v54, %v2980_v16 }
 0x2be   : > { %v2317_v36 = vpop.f32.mrf.mxu2 }
 0x2bf   : > { %v3056_v56 = vmax.f32 %v3020_v57, 0.0  ;;  %v2376_v44 = vadd.f32 %v2317_v36, %v5458_v49  ;;  %v2686_v5 = vpop.f32.mrf.mxu3  ;;  %v1969_v25 = vpop.f32.mrf.mxu1  ;;  %v2019_v57 = vadd.f32 %v1966_v3, %v4900_v43  ;;  %v5501_v36 = vld [vmem:[%s5576_s3] ss:$0 sm:$0xff] }
 0x2c1   : > { %v3308_v9 = vmul.f32 %v3211_v15, %v3056_v56  ;;  %v2745_v1 = vadd.f32 %v2686_v5, %v2376_v44  ;;  %v3231_v15 = vpop.permute.xlu0 %3230 }
 0x2c2   : > { %v2925_v45 = vpop.f32.mrf.mxu0 }
 0x2c3   : > { %v3364_v30 = vsel %vm3324_vm8, %v3308_v9, 0.0  ;;  %v2981_v6 = vadd.f32 %v2922_v12, %v2745_v1 }
 0x2c4   : > { %v3365_v29 = vadd.f32 %v3364_v30, %v3363_v26 }
 0x2c5   : > { %v3021_v34 = vadd.f32 %v5097_v54, %v2981_v6 }
 0x2c6   : > { %v2320_v55 = vpop.f32.mrf.mxu2 }
 0x2c7   : > { %v3057_v8 = vmax.f32 %v3021_v34, 0.0  ;;  %v2377_v61 = vadd.f32 %v2320_v55, %v5465_v62  ;;  %v2689_v46 = vpop.f32.mrf.mxu3  ;;  %v2020_v34 = vadd.f32 %v1969_v25, %v4916_v53  ;;  %v3241_v25 = vpop.permute.xlu2 %3240 }
 0x2c9   : > { %v3309_v11 = vmul.f32 %v3216_v18, %v3057_v8  ;;  %v2746_v49 = vadd.f32 %v2689_v46, %v2377_v61  ;;  %v3236_v18 = vpop.permute.xlu1 %3235 }
 0x2ca   : > { %v2927_v27 = vpop.f32.mrf.mxu0 }
 0x2cb   : > { %v3366_v31 = vsel %vm3324_vm8, %v3309_v11, 0.0  ;;  %v2982_v22 = vadd.f32 %v2925_v45, %v2746_v49 }
 0x2cc   : > { %v3367_v59 = vadd.f32 %v3366_v31, %v3365_v29 }
 0x2cd   : > { %v3022_v58 = vadd.f32 %v5097_v54, %v2982_v22 }
 0x2ce   : > { %v2322_v50 = vpop.f32.mrf.mxu2 }
 0x2cf   : > { %v3058_v23 = vmax.f32 %v3022_v58, 0.0  ;;  %v2378_v37 = vadd.f32 %v2322_v50, %v2017_v24  ;;  %v2691_v52 = vpop.f32.mrf.mxu3  ;;  %v1971_v24 = vpop.f32.mrf.mxu1 }
 0x2d0   : > { %v2021_v58 = vadd.f32 %v1971_v24, %v4937_v42 }
 0x2d1   : > { %v3310_v33 = vmul.f32 %v3221_v41, %v3058_v23  ;;  %v2747_v28 = vadd.f32 %v2691_v52, %v2378_v37 }
 0x2d2   : > { %v2930_v35 = vpop.f32.mrf.mxu0 }
 0x2d3   : > { %v3368_v62 = vsel %vm3324_vm8, %v3310_v33, 0.0  ;;  %v2983_v7 = vadd.f32 %v2927_v27, %v2747_v28 }
 0x2d4   : > { %v3369_v38 = vadd.f32 %v3368_v62, %v3367_v59 }
 0x2d5   : > { %v3023_v13 = vadd.f32 %v5097_v54, %v2983_v7 }
 0x2d6   : > { %v2325_v40 = vpop.f32.mrf.mxu2 }
 0x2d7   : > { %v3059_v21 = vmax.f32 %v3023_v13, 0.0  ;;  %v2379_v63 = vadd.f32 %v2325_v40, %v2018_v10  ;;  %v2694_v20 = vpop.f32.mrf.mxu3  ;;  %v1974_v29 = vpop.f32.mrf.mxu1 }
 0x2d8   : > { %v2022_v13 = vadd.f32 %v1974_v29, %v4953_v48 }
 0x2d9   : > { %v3311_v51 = vmul.f32 %v3226_v17, %v3059_v21  ;;  %v2748_v0 = vadd.f32 %v2694_v20, %v2379_v63  ;;  %v3246_v17 = vpop.permute.xlu0 %3245 }
 0x2da   : > { %v2932_v12 = vpop.f32.mrf.mxu0 }
 0x2db   : > { %v3370_v19 = vsel %vm3324_vm8, %v3311_v51, 0.0  ;;  %v2984_v16 = vadd.f32 %v2930_v35, %v2748_v0 }
 0x2dc   : > { %v3371_v26 = vadd.f32 %v3370_v19, %v3369_v38 }
 0x2dd   : > { %v3024_v54 = vadd.f32 %v5501_v36, %v2984_v16 }
 0x2de   : > { %v2327_v10 = vpop.f32.mrf.mxu2 }
 0x2df   : > { %v3060_v56 = vmax.f32 %v3024_v54, 0.0  ;;  %v2380_v44 = vadd.f32 %v2327_v10, %v2019_v57  ;;  %v2696_v5 = vpop.f32.mrf.mxu3  ;;  %v1976_v23 = vpop.f32.mrf.mxu1 }
 0x2e0   : > { %v2023_v57 = vadd.f32 %v1976_v23, %v4971_v47 }
 0x2e1   : > { %v3312_v9 = vmul.f32 %v3231_v15, %v3060_v56  ;;  %v2749_v1 = vadd.f32 %v2696_v5, %v2380_v44  ;;  %v3251_v5 = vpop.permute.xlu1 %3250 }
 0x2e2   : > { %v2935_v45 = vpop.f32.mrf.mxu0 }
 0x2e3   : > { %v3372_v30 = vsel %vm3324_vm8, %v3312_v9, 0.0  ;;  %v2985_v6 = vadd.f32 %v2932_v12, %v2749_v1 }
 0x2e4   : > { %v3373_v43 = vadd.f32 %v3372_v30, %v3371_v26 }
 0x2e5   : > { %v3025_v3 = vadd.f32 %v5501_v36, %v2985_v6 }
 0x2e6   : > { %v2330_v55 = vpop.f32.mrf.mxu2 }
 0x2e7   : > { %v3061_v8 = vmax.f32 %v3025_v3, 0.0  ;;  %v2381_v61 = vadd.f32 %v2330_v55, %v2020_v34  ;;  %v2699_v46 = vpop.f32.mrf.mxu3  ;;  %v1979_v51 = vpop.f32.mrf.mxu1 }
 0x2e9   : > { %v3313_v11 = vmul.f32 %v3236_v18, %v3061_v8  ;;  %v2750_v49 = vadd.f32 %v2699_v46, %v2381_v61  ;;  %v3256_v61 = vpop.permute.xlu2 %3255 }
 0x2ea   : > { %v2937_v27 = vpop.f32.mrf.mxu0 }
 0x2eb   : > { %v3374_v31 = vsel %vm3324_vm8, %v3313_v11, 0.0  ;;  %v2986_v22 = vadd.f32 %v2935_v45, %v2750_v49 }
 0x2ec   : > { %v3375_v59 = vadd.f32 %v3374_v31, %v3373_v43  ;;  %v2024_v43 = vadd.f32 %v1979_v51, %v4987_v32 }
 0x2ed   : > { %v3026_v50 = vadd.f32 %v5501_v36, %v2986_v22 }
 0x2ee   : > { %v2332_v53 = vpop.f32.mrf.mxu2 }
 0x2ef   : > { %v3062_v37 = vmax.f32 %v3026_v50, 0.0  ;;  %v2382_v52 = vadd.f32 %v2332_v53, %v2021_v58  ;;  %v2701_v41 = vpop.f32.mrf.mxu3  ;;  %v1981_v1 = vpop.f32.mrf.mxu1 }
 0x2f1   : > { %v3314_v33 = vmul.f32 %v3241_v25, %v3062_v37  ;;  %v2751_v28 = vadd.f32 %v2701_v41, %v2382_v52  ;;  %v3261_v37 = vpop.permute.xlu0 %3260 }
 0x2f2   : > { %v2940_v35 = vpop.f32.mrf.mxu0 }
 0x2f3   : > { %v3376_v62 = vsel %vm3324_vm8, %v3314_v33, 0.0  ;;  %v2987_v7 = vadd.f32 %v2937_v27, %v2751_v28 }
 0x2f4   : > { %v3377_v38 = vadd.f32 %v3376_v62, %v3375_v59  ;;  %v2025_v59 = vadd.f32 %v1981_v1, %v5006_v4 }
 0x2f5   : > { %v3027_v40 = vadd.f32 %v5501_v36, %v2987_v7 }
 0x2f6   : > { %v2335_v42 = vpop.f32.mrf.mxu2 }
 0x2f7   : > { %v3063_v21 = vmax.f32 %v3027_v40, 0.0  ;;  %v2383_v63 = vadd.f32 %v2335_v42, %v2022_v13  ;;  %v2704_v20 = vpop.f32.mrf.mxu3  ;;  %v1984_v22 = vpop.f32.mrf.mxu1 }
 0x2f8   : > { %v2026_v7 = vadd.f32 %v1984_v22, %v5023_v60 }
 0x2f9   : > { %v3315_v0 = vmul.f32 %v3246_v17, %v3063_v21  ;;  %v2752_v24 = vadd.f32 %v2704_v20, %v2383_v63  ;;  %v3266_v21 = vpop.permute.xlu1 %3265 }
 0x2fa   : > { %v2942_v12 = vpop.f32.mrf.mxu0 }
 0x2fb   : > { %v3378_v19 = vsel %vm3324_vm8, %v3315_v0, 0.0  ;;  %v2988_v16 = vadd.f32 %v2940_v35, %v2752_v24 }
 0x2fc   : > { %v3379_v26 = vadd.f32 %v3378_v19, %v3377_v38 }
 0x2fd   : > { %v3028_v54 = vadd.f32 %v5501_v36, %v2988_v16 }
 0x2fe   : > { %v2337_v48 = vpop.f32.mrf.mxu2 }
 0x2ff   : > { %v3064_v10 = vmax.f32 %v3028_v54, 0.0  ;;  %v2384_v56 = vadd.f32 %v2337_v48, %v2023_v57  ;;  %v2706_v44 = vpop.f32.mrf.mxu3  ;;  %v1986_v38 = vpop.f32.mrf.mxu1 }
 0x300   : > { %v2027_v24 = vadd.f32 %v1986_v38, %v5043_v2  ;;  %v3271_v54 = vpop.permute.xlu2 %3270 }
 0x301   : > { %v3316_v15 = vmul.f32 %v3251_v5, %v3064_v10  ;;  %v2753_v9 = vadd.f32 %v2706_v44, %v2384_v56 }
 0x302   : > { %v2945_v45 = vpop.f32.mrf.mxu0 }
 0x303   : > { %v3380_v30 = vsel %vm3324_vm8, %v3316_v15, 0.0  ;;  %v2989_v6 = vadd.f32 %v2942_v12, %v2753_v9 }
 0x304   : > { %v3381_v29 = vadd.f32 %v3380_v30, %v3379_v26 }
 0x305   : > { %v3029_v34 = vadd.f32 %v5501_v36, %v2989_v6 }
 0x306   : > { %v2340_v47 = vpop.f32.mrf.mxu2 }
 0x307   : > { %v3065_v3 = vmax.f32 %v3029_v34, 0.0  ;;  %v2385_v55 = vadd.f32 %v2340_v47, %v2024_v43  ;;  %v2709_v8 = vpop.f32.mrf.mxu3  ;;  %v1989_v48 = vpop.f32.mrf.mxu1 }
 0x308   : > { %v2028_v9 = vadd.f32 %v1989_v48, %v5056_v39 }
 0x309   : > { %v3317_v46 = vmul.f32 %v3256_v61, %v3065_v3  ;;  %v2754_v18 = vadd.f32 %v2709_v8, %v2385_v55 }
 0x30a   : > { %v2947_v31 = vpop.f32.mrf.mxu0 }
 0x30b   : > { %v3382_v11 = vsel %vm3324_vm8, %v3317_v46, 0.0  ;;  %v2990_v49 = vadd.f32 %v2945_v45, %v2754_v18 }
 0x30c   : > { %v3383_v27 = vadd.f32 %v3382_v11, %v3381_v29  ;;  %v3276_v29 = vpop.permute.xlu0 %3275 }
 0x30d   : > { %v3030_v58 = vadd.f32 %v5501_v36, %v2990_v49 }
 0x30e   : > { %v2342_v32 = vpop.f32.mrf.mxu2 }
 0x30f   : > { %v3066_v50 = vmax.f32 %v3030_v58, 0.0  ;;  %v2386_v23 = vadd.f32 %v2342_v32, %v2025_v59  ;;  %v2711_v53 = vpop.f32.mrf.mxu3  ;;  %v1991_v3 = vpop.f32.mrf.mxu1 }
 0x310   : > { %v2029_v46 = vadd.f32 %v1991_v3, %v5081_v14  ;;  %v3286_v14 = vpop.permute.xlu2 %3285 }
 0x311   : > { %v3318_v52 = vmul.f32 %v3261_v37, %v3066_v50  ;;  %v2755_v41 = vadd.f32 %v2711_v53, %v2386_v23 }
 0x312   : > { %v2950_v62 = vpop.f32.mrf.mxu0 }
 0x313   : > { %v3384_v25 = vsel %vm3324_vm8, %v3318_v52, 0.0  ;;  %v2991_v33 = vadd.f32 %v2947_v31, %v2755_v41  ;;  %v3281_v31 = vpop.permute.xlu1 %3280 }
 0x314   : > { %v3385_v28 = vadd.f32 %v3384_v25, %v3383_v27 }
 0x315   : > { %v3031_v35 = vadd.f32 %v5501_v36, %v2991_v33 }
 0x316   : > { %v2345_v4 = vpop.f32.mrf.mxu2 }
 0x317   : > { %v3067_v13 = vmax.f32 %v3031_v35, 0.0  ;;  %v2387_v40 = vadd.f32 %v2345_v4, %v2026_v7  ;;  %v2714_v42 = vpop.f32.mrf.mxu3 }
 0x319   : > { %v3319_v63 = vmul.f32 %v3266_v21, %v3067_v13  ;;  %v2756_v20 = vadd.f32 %v2714_v42, %v2387_v40 }
 0x31a   : > { %v2952_v16 = vpop.f32.mrf.mxu0 }
 0x31b   : > { %v3386_v17 = vsel %vm3324_vm8, %v3319_v63, 0.0  ;;  %v2992_v51 = vadd.f32 %v2950_v62, %v2756_v20 }
 0x31c   : > { %v3387_v0 = vadd.f32 %v3386_v17, %v3385_v28 }
 0x31d   : > { %v3032_v19 = vadd.f32 %v5501_v36, %v2992_v51 }
 0x31e   : > { %v2347_v60 = vpop.f32.mrf.mxu2 }
 0x31f   : > { %v3068_v12 = vmax.f32 %v3032_v19, 0.0  ;;  %v2388_v26 = vadd.f32 %v2347_v60, %v2027_v24  ;;  %v2716_v57 = vpop.f32.mrf.mxu3 }
 0x321   : > { %v3320_v10 = vmul.f32 %v3271_v54, %v3068_v12  ;;  %v2757_v56 = vadd.f32 %v2716_v57, %v2388_v26 }
 0x322   : > { %v2955_v43 = vpop.f32.mrf.mxu0 }
 0x323   : > { %v3388_v44 = vsel %vm3324_vm8, %v3320_v10, 0.0  ;;  %v2993_v5 = vadd.f32 %v2952_v16, %v2757_v56 }
 0x324   : > { %v3389_v15 = vadd.f32 %v3388_v44, %v3387_v0 }
 0x325   : > { %v3033_v1 = vadd.f32 %v5501_v36, %v2993_v5 }
 0x326   : > { %v2350_v2 = vpop.f32.mrf.mxu2 }
 0x327   : > { %v3069_v30 = vmax.f32 %v3033_v1, 0.0  ;;  %v2389_v6 = vadd.f32 %v2350_v2, %v2028_v9  ;;  %v2719_v45 = vpop.f32.mrf.mxu3 }
 0x329   : > { %v3321_v34 = vmul.f32 %v3276_v29, %v3069_v30  ;;  %v2758_v47 = vadd.f32 %v2719_v45, %v2389_v6 }
 0x32a   : > { %v2957_v58 = vpop.f32.mrf.mxu0 }
 0x32b   : > { %v3390_v55 = vsel %vm3324_vm8, %v3321_v34, 0.0  ;;  %v2994_v8 = vadd.f32 %v2955_v43, %v2758_v47 }
 0x32c   : > { %v3391_v61 = vadd.f32 %v3390_v55, %v3389_v15 }
 0x32d   : > { %v3034_v18 = vadd.f32 %v5501_v36, %v2994_v8 }
 0x32e   : > { %v2352_v39 = vpop.f32.mrf.mxu2 }
 0x32f   : > { %v3070_v11 = vmax.f32 %v3034_v18, 0.0  ;;  %v2390_v49 = vadd.f32 %v2352_v39, %v2029_v46  ;;  %v2721_v22 = vpop.f32.mrf.mxu3 }
 0x331   : > { %v3322_v27 = vmul.f32 %v3281_v31, %v3070_v11  ;;  %v2759_v59 = vadd.f32 %v2721_v22, %v2390_v49 }
 0x333   : > { %v3392_v32 = vsel %vm3324_vm8, %v3322_v27, 0.0  ;;  %v2995_v50 = vadd.f32 %v2957_v58, %v2759_v59 }
 0x334   : > { %v3393_v23 = vadd.f32 %v3392_v32, %v3391_v61 }
 0x335   : > { %v3035_v53 = vadd.f32 %v5501_v36, %v2995_v50  ;;  %v3408_v36 = vld [vmem:[%s5578_s5] sm:$0x1] }
 0x337   : > { %v3071_v37 = vmax.f32 %v3035_v53, 0.0 }
 0x339   : > { %v3323_v52 = vmul.f32 %v3286_v14, %v3071_v37 }
 0x33b   : > { %v3394_v41 = vsel %vm3324_vm8, %v3323_v52, 0.0 }
 0x33c   : > { %v3395_v25 = vadd.f32 %v3394_v41, %v3393_v23 }
 0x33e   : > { %v3396_v33 = vrot.slane %v3395_v25, 4 }
 0x340   : > { %v3397_v28 = vadd.f32 %v3396_v33, %v3395_v25 }
 0x342   : > { %v3398_v62 = vrot.slane %v3397_v28, 2 }
 0x344   : > { %v3399_v7 = vadd.f32 %v3398_v62, %v3397_v28 }
 0x346   : > { %v3400_v35 = vrot.slane %v3399_v7, 1 }
 0x348   : > { %v3401_v38 = vadd.f32 %v3400_v35, %v3399_v7 }
 0x34a   : > { %v3402_v4 = vmul.f32 0.00390625, %v3401_v38 }
 0x34c   : > { %v3403_v13 = vpack.c.bf16 %v3402_v4, %v3402_v4 }
 0x34e   : > { %3893 = vmatmul.msk.bf16.vlgmr.msrb.gmra.mxu1 %vm3324_vm8, %v3403_v13 }
 0x3cb   : > { %v3433_v40 = vpop.f32.mrf.mxu1 }
 0x3cc   : > { %v3434_v42 = vadd.f32 %v3433_v40, %v3408_v36 }
 0x3ce   : > { %3437 = vst [vmem:[%s243_s18] sm:$0x1] %v3434_v42 }
 0x3cf   : > { %4045 = shalt.err (!%p4042_p3)
}
 0x3d0   : > { %3960 = dma.vmem_to_hbm [thread:$0]  (%p4156_p5), %s3450_s19, 16, %s3452_s20, %s3439_s28  }
 0x3d3   : > { %v3435_v21 = vpop.f32.mrf.mxu1 }
 0x3d4 PF: > { %p3966_p4 = scmp.ge.s32.totalorder %s4080_s24, 2  ;;  %s3463_s12 = sand.u32 1, %s4068_s21  }
 0x3d5   : > { %s3464_s14 = scalar_lea.sflag [#allocation3], %s3463_s12 }
 0x3d6   : > { %p3963_p7 = pnand %p3966_p4, %p4160_p6 }
 0x3d8   : > { %p3964_p8 = pneg %p3963_p7 }
 0x3da   : > { %4063 = dma.done.wait (%p3964_p8), %s3464_s14, 16  }
 0x3db   : > { %4065 = vsyncadd (%p3964_p8), %s3464_s14, 4294967280  ;;  %p16_p9 = scmp.ge.s32.totalorder %s4143_s27, 4   ;;  %s5602_s21 = smov %s4072_s22 }
 0x3dc   : > { %s5603_s22 = smov %s4076_s23  ;;  %s5604_s23 = smov %s4154_s30 }
 0x3dd   : > { %s5605_s24 = smov %s4143_s27  ;;  %18 = sbr.rel (!%p16_p9) target bundleno = 3 (0x3), region = 87 }
 0x3e2   :  { %3469 = vsyncpa [#allocation3], 1 }
 0x3e3   :  { %3471 = vsyncpa [#allocation3 + $0x1], 1 }

</bundles_post_ra>
